<compile_context>
chip_gen: v7x
topology: tpu7x:2x2x1
jax: 0.10.0
libtpu: 0.0.40
codegen_flags: <defaults>
</compile_context>

<pallas_src>
import functools

import jax
import jax.numpy as jnp
from jax.experimental import pallas as pl
from jax.experimental.pallas import tpu as pltpu

TOP_K = 5        # fixed by the reference module (torch.topk(d, 5, largest=False))
IDX_ROWS = 8     # index output padded to 8 sublane rows (rows 5..7 unused)


def _round_up(x, m):
    return ((x + m - 1) // m) * m


def _vmem_capacity_bytes():
    """Per-core physical VMEM, generation aware; conservative fallback."""
    try:
        info = pltpu.get_tpu_info()
        cap = int(getattr(info, "vmem_capacity_bytes", 0))
        if cap > 0:
            return cap
    except Exception:
        pass
    return 64 * 1024 * 1024      # v7x-sized conservative default


def _pick_tile_n(n_rows, n_e, e_dim, vmem_budget, requested):
    """Row (lane) tile: multiple of 128, sized from the VMEM budget."""
    n_lanes = _round_up(n_rows, 128)
    if requested is not None:
        t = max(128, _round_up(int(requested), 128))
    else:
        # f32 bytes per lane column: z + z_q blocks (2 bufs each), idx (2), sse (2)
        # plus ~8 live (n_e, tile_n) intermediates (d, onehot_sum, masks, ...).
        per_col = 4 * (2 * e_dim + 2 * e_dim + 2 * IDX_ROWS + 2 * 1 + 8 * n_e)
        fixed = 4 * (2 * n_e * e_dim + 2 * n_e) + (2 << 20)   # codebook, esq, slack
        t = max(128, ((vmem_budget - fixed) // per_col) // 128 * 128)
        # generation cap: big tiles on 128 MiB parts (v5e/v6e), modest on 64 MiB (v7x)
        t = min(t, 2048 if vmem_budget >= (80 << 20) else 512)
    # keep at least 2 grid tiles when rows allow (v7x: 2 TensorCores share the
    # "parallel" grid axis; a single tile would idle one core).
    if n_lanes >= 256:
        t = min(t, max(128, (n_lanes // 2) // 128 * 128))
    return min(t, n_lanes)


def vq_kernel(zt_ref, e_ref, hesq_ref, zq_ref, idx_ref, sse_ref, *,
              distance_in_bf16=False):
    """One row tile, rows-on-lanes layout.

    zt_ref   : (e_dim, tile_n)    input vectors, transposed (features on sublanes)
    e_ref    : (n_e, e_dim)       full codebook (resident, constant index_map)
    hesq_ref : (n_e, 1)           0.5 * ||e||^2 per code
    zq_ref   : (e_dim, tile_n)    averaged top-5 embeddings (transposed, lane-dense)
    idx_ref  : (IDX_ROWS, tile_n) int32; row k (k < TOP_K) = k-th nearest code id
    sse_ref  : (1, tile_n)        per-row sum((z_q - z)^2) over the feature axis
    """
    zt_f32 = zt_ref[...].astype(jnp.float32)              # (D, tn)
    e = e_ref[...].astype(jnp.float32)                    # (K, D)
    half_esq = hesq_ref[...].astype(jnp.float32)          # (K, 1)
    n_codes = e.shape[0]
    tn = zt_f32.shape[1]

    # Argmin-equivalent distance (scaled by 1/2, per-row ||z||^2 dropped):
    #   d_hat = 0.5*||e||^2 - e.z   has the same top-k as ||z - e||^2.
    if distance_in_bf16:
        # opt-in (mainly v5e): bf16 inputs, f32 accumulation; selection only.
        ze = jax.lax.dot_general(
            e.astype(jnp.bfloat16), zt_ref[...].astype(jnp.bfloat16),
            (((1,), (0,)), ((), ())), preferred_element_type=jnp.float32)
    else:
        ze = jax.lax.dot_general(
            e, zt_f32, (((1,), (0,)), ((), ())),
            preferred_element_type=jnp.float32)            # (K, tn)
    d = half_esq - ze                                      # (K, tn)

    code_ids = jax.lax.broadcasted_iota(jnp.int32, (n_codes, 1), 0)     # (K, 1)
    out_rows = jax.lax.broadcasted_iota(jnp.int32, (IDX_ROWS, tn), 0)   # (8, tn)

    onehot_sum = jnp.zeros((n_codes, tn), jnp.float32)
    idx_rows = jnp.zeros((IDX_ROWS, tn), jnp.int32)

    # Iterative top-5 over the (sublane) code axis.  The argmin comes out
    # directly in lane orientation -> no transposes / index matmuls needed.
    for k in range(TOP_K):
        d_min = jnp.min(d, axis=0, keepdims=True)                          # (1, tn)
        min_idx = jnp.min(jnp.where(d == d_min, code_ids, n_codes),
                          axis=0, keepdims=True)                           # (1, tn)
        mask = code_ids == min_idx           # exact one-hot (lowest index on ties)
        onehot_sum = onehot_sum + mask.astype(jnp.float32)
        d = jnp.where(mask, jnp.inf, d)
        idx_rows = jnp.where(out_rows == k, min_idx, idx_rows)

    # Single fused gather: e^T @ (sum of the 5 one-hots), then / 5.
    zq = jax.lax.dot_general(e, onehot_sum, (((0,), (0,)), ((), ())),
                             preferred_element_type=jnp.float32) * (1.0 / TOP_K)

    zq_ref[...] = zq.astype(zq_ref.dtype)
    idx_ref[...] = idx_rows

    diff = zq - zt_f32
    sse_ref[...] = jnp.sum(diff * diff, axis=0, keepdims=True)             # (1, tn)


def vector_quantizer_conv_avg(z, embedding, beta, *, tile_n=None,
                              xla_fallback_rows=128, distance_in_bf16=False):
    """Forward pass of VectorQuantizer_conv_avg.

    Returns (z_q, top_k_indices, loss, qq_loss) matching the PyTorch forward
    values (indices are int32 instead of int64).
    """
    # TODO(synk): training gradients (codebook vs commitment stop_gradient split
    # of the loss + straight-through estimator) need a custom_vjp; forward-only.
    n_e, e_dim = embedding.shape
    if n_e < TOP_K:
        raise ValueError(f"n_e={n_e} must be >= {TOP_K} for top-{TOP_K} selection")
    z_flat = z.reshape(-1, e_dim)
    N = z_flat.shape[0]

    # Small-N fast path: a single pallas_call's fixed cost dwarfs the work.
    if N < xla_fallback_rows:
        zf = z_flat.astype(jnp.float32)
        ef = embedding.astype(jnp.float32)
        d = (jnp.sum(zf * zf, axis=1, keepdims=True)
             + jnp.sum(ef * ef, axis=1)[None, :] - 2.0 * (zf @ ef.T))
        _, idx = jax.lax.top_k(-d, TOP_K)
        zq_f = jnp.mean(ef[idx], axis=1)
        mse = jnp.mean((zq_f - zf) ** 2)
        return (zq_f.astype(z.dtype).reshape(z.shape), idx.astype(jnp.int32),
                (1.0 + beta) * mse, jnp.float32(0.0))

    vmem_cap = _vmem_capacity_bytes()
    vmem_budget = int(vmem_cap * 0.8)      # leave headroom below physical VMEM
    tn = _pick_tile_n(N, n_e, e_dim, vmem_budget, tile_n)
    N_pad = _round_up(N, tn)
    num_tiles = N_pad // tn

    z_t = z_flat.T                          # (e_dim, N): rows on the lane axis
    if N_pad != N:
        z_t = jnp.pad(z_t, ((0, 0), (0, N_pad - N)))

    e_f32 = embedding.astype(jnp.float32)
    half_esq = (0.5 * jnp.sum(e_f32 * e_f32, axis=1))[:, None]     # (n_e, 1)

    # Resident operands (constant index_map): single-buffer them when the
    # codebook is large enough that a second pipeline buffer actually costs VMEM
    # (irrelevant at tiny codebooks, decisive headroom on 64 MiB v7x parts).
    resident_kwargs = {}
    if n_e * e_dim * 4 >= (1 << 21):
        resident_kwargs["pipeline_mode"] = pl.Buffered(1)

    kernel = functools.partial(vq_kernel, distance_in_bf16=distance_in_bf16)

    zq_t, idx_pad, sse_part = pl.pallas_call(
        kernel,
        out_shape=(
            jax.ShapeDtypeStruct((e_dim, N_pad), z.dtype),
            jax.ShapeDtypeStruct((IDX_ROWS, N_pad), jnp.int32),
            jax.ShapeDtypeStruct((1, N_pad), jnp.float32),
        ),
        grid_spec=pltpu.PrefetchScalarGridSpec(
            num_scalar_prefetch=0,
            grid=(num_tiles,),
            in_specs=[
                pl.BlockSpec((e_dim, tn), lambda i: (0, i)),          # z (transposed)
                pl.BlockSpec((n_e, e_dim), lambda i: (0, 0), **resident_kwargs),
                pl.BlockSpec((n_e, 1), lambda i: (0, 0), **resident_kwargs),
            ],
            out_specs=[
                pl.BlockSpec((e_dim, tn), lambda i: (0, i)),          # z_q (lane-dense)
                pl.BlockSpec((IDX_ROWS, tn), lambda i: (0, i)),       # indices
                pl.BlockSpec((1, tn), lambda i: (0, i)),              # partial SSE
            ],
        ),
        compiler_params=pltpu.CompilerParams(
            dimension_semantics=("parallel",),
            vmem_limit_bytes=vmem_budget,
        ),
    )(z_t, embedding, half_esq)

    z_q = zq_t[:, :N].T.reshape(z.shape)
    top_k_indices = idx_pad[:TOP_K, :N].T                  # (N, TOP_K) int32

    # loss = mean((z_q.detach()-z)^2) + beta*mean((z_q-z.detach())^2); both terms
    # share the forward value -> (1+beta)*MSE.  SSE was accumulated in-kernel
    # (lane-dense per-row partials), so no extra HBM pass over z / z_q here.
    mse = jnp.sum(sse_part[0, :N]) / jnp.float32(N * e_dim)
    loss = (1.0 + beta) * mse

    # Straight-through estimator: forward value of z + stop_grad(z_q - z) is
    # exactly z_q, so return z_q directly (forward-only).
    qq_loss = jnp.float32(0.0)   # the reference module always returns tensor(0.0)
    return z_q, top_k_indices, loss, qq_loss


if __name__ == "__main__":
    n_e, e_dim, beta = 64, 32, 0.25
    B, T = 2, 256          # N = 512 rows -> >= 2 lane tiles (feeds both v7x cores)

    key = jax.random.PRNGKey(0)
    k_z, k_e = jax.random.split(key)
    z = jax.random.normal(k_z, (B, T, e_dim), dtype=jnp.float32)
    # embedding.weight.data.uniform_(-1/n_e, 1/n_e), deterministic init
    embedding = jax.random.uniform(k_e, (n_e, e_dim),
                                   minval=-1.0 / n_e, maxval=1.0 / n_e,
                                   dtype=jnp.float32)

    z_q, top_k_indices, loss, qq_loss = vector_quantizer_conv_avg(z, embedding, beta)
    jax.block_until_ready((z_q, top_k_indices, loss, qq_loss))

    assert z_q.shape == z.shape and z_q.dtype == z.dtype
    assert top_k_indices.shape == (B * T, TOP_K)

    # --- reference checks (tie-tolerant) ------------------------------------
    zf = z.reshape(-1, e_dim)
    d_ref = (jnp.sum(zf * zf, axis=1, keepdims=True)
             + jnp.sum(embedding * embedding, axis=1)
             - 2.0 * zf @ embedding.T)

    # (a) z_q must equal the mean of the codes the kernel itself selected
    #     (validates the fused one-hot gather, independent of tie resolution).
    zq_from_idx = jnp.mean(embedding[top_k_indices], axis=1).reshape(z.shape)
    err_gather = float(jnp.max(jnp.abs(z_q - zq_from_idx)))
    assert err_gather < 5e-6, f"fused gather mismatch: {err_gather}"

    # (b) the selected codes form a valid top-5 set: their reference distances
    #     match the 5 smallest reference distances (robust to near-tie swaps).
    d_sel = jnp.sort(jnp.take_along_axis(d_ref, top_k_indices, axis=1), axis=1)
    d_best = -jax.lax.top_k(-d_ref, TOP_K)[0]
    err_dist = float(jnp.max(jnp.abs(d_sel - d_best)))
    assert err_dist < 1e-3, f"top-5 selection mismatch: {err_dist}"

    # (c) loss == (1 + beta) * mean((z_q - z)^2)  (in-kernel SSE path)
    mse_chk = float(jnp.mean((z_q.astype(jnp.float32) - z) ** 2))
    assert abs(float(loss) - (1.0 + beta) * mse_chk) < 1e-4, "loss mismatch"
    assert float(qq_loss) == 0.0

    # small-N XLA fallback path (module-sized input): shape sanity only
    z_small = jax.random.normal(key, (2, 8, e_dim), dtype=jnp.float32)
    zq_s, idx_s, loss_s, _ = vector_quantizer_conv_avg(z_small, embedding, beta)
    jax.block_until_ready((zq_s, idx_s, loss_s))
    assert zq_s.shape == z_small.shape and idx_s.shape == (16, TOP_K)

    print("KERNEL_OK")
</pallas_src>

<mosaic_0001>
module attributes {stable_mosaic.version = 11 : i64} {
  func.func @vq_kernel(%arg0: i32, %arg1: memref<32x256xf32, #tpu.memory_space<vmem>>, %arg2: memref<64x32xf32, #tpu.memory_space<vmem>>, %arg3: memref<64x1xf32, #tpu.memory_space<vmem>>, %arg4: memref<32x256xf32, #tpu.memory_space<vmem>>, %arg5: memref<8x256xi32, #tpu.memory_space<vmem>>, %arg6: memref<1x256xf32, #tpu.memory_space<vmem>>) attributes {dimension_semantics = [#tpu.dimension_semantics<parallel>], iteration_bounds = array<i64: 2>, scalar_prefetch = 0 : i64, scratch_operands = 0 : i64, tpu.core_type = #tpu.core_type<tc>, window_params = [{transform_indices = @transform_0, window_bounds = array<i64: 32, 256>}, {pipeline_mode = #tpu.pipeline_mode<synchronous>, transform_indices = @transform_1, window_bounds = array<i64: 64, 32>}, {pipeline_mode = #tpu.pipeline_mode<synchronous>, transform_indices = @transform_2, window_bounds = array<i64: 64, 1>}, {transform_indices = @transform_3, window_bounds = array<i64: 32, 256>}, {transform_indices = @transform_4, window_bounds = array<i64: 8, 256>}, {transform_indices = @transform_5, window_bounds = array<i64: 1, 256>}]} {
    %c0 = arith.constant 0 : index
    %c0_0 = arith.constant 0 : index
    %0 = vector.load %arg1[%c0, %c0_0] : memref<32x256xf32, #tpu.memory_space<vmem>>, vector<32x256xf32>
    %c0_1 = arith.constant 0 : index
    %c0_2 = arith.constant 0 : index
    %1 = vector.load %arg2[%c0_1, %c0_2] : memref<64x32xf32, #tpu.memory_space<vmem>>, vector<64x32xf32>
    %c0_3 = arith.constant 0 : index
    %c0_4 = arith.constant 0 : index
    %2 = vector.load %arg3[%c0_3, %c0_4] : memref<64x1xf32, #tpu.memory_space<vmem>>, vector<64x1xf32>
    %cst = arith.constant dense<0.000000e+00> : vector<64x256xf32>
    %3 = tpu.matmul %1, %0, %cst {dimension_numbers = #tpu.dot_dimension_numbers<[1], [0], [0], [1], [0, 0, 1, 1], [], []>} : vector<64x32xf32>, vector<32x256xf32>, vector<64x256xf32> -> vector<64x256xf32>
    %4 = vector.broadcast %2 : vector<64x1xf32> to vector<64x256xf32>
    %5 = arith.subf %4, %3 : vector<64x256xf32>
    %6 = tpu.iota {dimensions = array<i32: 0>} : vector<64x1xi32>
    %7 = tpu.iota {dimensions = array<i32: 0>} : vector<8x256xi32>
    %cst_5 = arith.constant 0.000000e+00 : f32
    %8 = vector.broadcast %cst_5 : f32 to vector<64x256xf32>
    %c0_i32 = arith.constant 0 : i32
    %9 = vector.broadcast %c0_i32 : i32 to vector<8x256xi32>
    %cst_6 = arith.constant dense<0x7F800000> : vector<256xf32>
    %10 = vector.multi_reduction <minimumf>, %5, %cst_6 [0] : vector<64x256xf32> to vector<256xf32>
    %11 = vector.shape_cast %10 : vector<256xf32> to vector<1x256xf32>
    %12 = vector.broadcast %11 : vector<1x256xf32> to vector<64x256xf32>
    %13 = arith.cmpf oeq, %5, %12 : vector<64x256xf32>
    %c64_i32 = arith.constant 64 : i32
    %14 = vector.shape_cast %6 : vector<64x1xi32> to vector<64x1xi32>
    %15 = vector.broadcast %14 : vector<64x1xi32> to vector<64x256xi32>
    %16 = vector.broadcast %c64_i32 : i32 to vector<64x256xi32>
    %17 = arith.select %13, %15, %16 : vector<64x256xi1>, vector<64x256xi32>
    %cst_7 = arith.constant dense<2147483647> : vector<256xi32>
    %18 = vector.multi_reduction <minsi>, %17, %cst_7 [0] : vector<64x256xi32> to vector<256xi32>
    %19 = vector.shape_cast %18 : vector<256xi32> to vector<1x256xi32>
    %20 = vector.broadcast %6 : vector<64x1xi32> to vector<64x256xi32>
    %21 = vector.broadcast %19 : vector<1x256xi32> to vector<64x256xi32>
    %22 = arith.cmpi eq, %20, %21 : vector<64x256xi32>
    %23 = arith.extui %22 : vector<64x256xi1> to vector<64x256xi32>
    %24 = arith.sitofp %23 : vector<64x256xi32> to vector<64x256xf32>
    %25 = arith.addf %8, %24 : vector<64x256xf32>
    %cst_8 = arith.constant 0x7F800000 : f32
    %26 = vector.broadcast %cst_8 : f32 to vector<64x256xf32>
    %27 = arith.select %22, %26, %5 : vector<64x256xi1>, vector<64x256xf32>
    %c0_i32_9 = arith.constant 0 : i32
    %28 = vector.broadcast %c0_i32_9 : i32 to vector<8x256xi32>
    %29 = arith.cmpi eq, %7, %28 : vector<8x256xi32>
    %30 = vector.shape_cast %19 : vector<1x256xi32> to vector<1x256xi32>
    %31 = vector.broadcast %30 : vector<1x256xi32> to vector<8x256xi32>
    %32 = arith.select %29, %31, %9 : vector<8x256xi1>, vector<8x256xi32>
    %cst_10 = arith.constant dense<0x7F800000> : vector<256xf32>
    %33 = vector.multi_reduction <minimumf>, %27, %cst_10 [0] : vector<64x256xf32> to vector<256xf32>
    %34 = vector.shape_cast %33 : vector<256xf32> to vector<1x256xf32>
    %35 = vector.broadcast %34 : vector<1x256xf32> to vector<64x256xf32>
    %36 = arith.cmpf oeq, %27, %35 : vector<64x256xf32>
    %c64_i32_11 = arith.constant 64 : i32
    %37 = vector.shape_cast %6 : vector<64x1xi32> to vector<64x1xi32>
    %38 = vector.broadcast %37 : vector<64x1xi32> to vector<64x256xi32>
    %39 = vector.broadcast %c64_i32_11 : i32 to vector<64x256xi32>
    %40 = arith.select %36, %38, %39 : vector<64x256xi1>, vector<64x256xi32>
    %cst_12 = arith.constant dense<2147483647> : vector<256xi32>
    %41 = vector.multi_reduction <minsi>, %40, %cst_12 [0] : vector<64x256xi32> to vector<256xi32>
    %42 = vector.shape_cast %41 : vector<256xi32> to vector<1x256xi32>
    %43 = vector.broadcast %6 : vector<64x1xi32> to vector<64x256xi32>
    %44 = vector.broadcast %42 : vector<1x256xi32> to vector<64x256xi32>
    %45 = arith.cmpi eq, %43, %44 : vector<64x256xi32>
    %46 = arith.extui %45 : vector<64x256xi1> to vector<64x256xi32>
    %47 = arith.sitofp %46 : vector<64x256xi32> to vector<64x256xf32>
    %48 = arith.addf %25, %47 : vector<64x256xf32>
    %cst_13 = arith.constant 0x7F800000 : f32
    %49 = vector.broadcast %cst_13 : f32 to vector<64x256xf32>
    %50 = arith.select %45, %49, %27 : vector<64x256xi1>, vector<64x256xf32>
    %c1_i32 = arith.constant 1 : i32
    %51 = vector.broadcast %c1_i32 : i32 to vector<8x256xi32>
    %52 = arith.cmpi eq, %7, %51 : vector<8x256xi32>
    %53 = vector.shape_cast %42 : vector<1x256xi32> to vector<1x256xi32>
    %54 = vector.broadcast %53 : vector<1x256xi32> to vector<8x256xi32>
    %55 = arith.select %52, %54, %32 : vector<8x256xi1>, vector<8x256xi32>
    %cst_14 = arith.constant dense<0x7F800000> : vector<256xf32>
    %56 = vector.multi_reduction <minimumf>, %50, %cst_14 [0] : vector<64x256xf32> to vector<256xf32>
    %57 = vector.shape_cast %56 : vector<256xf32> to vector<1x256xf32>
    %58 = vector.broadcast %57 : vector<1x256xf32> to vector<64x256xf32>
    %59 = arith.cmpf oeq, %50, %58 : vector<64x256xf32>
    %c64_i32_15 = arith.constant 64 : i32
    %60 = vector.shape_cast %6 : vector<64x1xi32> to vector<64x1xi32>
    %61 = vector.broadcast %60 : vector<64x1xi32> to vector<64x256xi32>
    %62 = vector.broadcast %c64_i32_15 : i32 to vector<64x256xi32>
    %63 = arith.select %59, %61, %62 : vector<64x256xi1>, vector<64x256xi32>
    %cst_16 = arith.constant dense<2147483647> : vector<256xi32>
    %64 = vector.multi_reduction <minsi>, %63, %cst_16 [0] : vector<64x256xi32> to vector<256xi32>
    %65 = vector.shape_cast %64 : vector<256xi32> to vector<1x256xi32>
    %66 = vector.broadcast %6 : vector<64x1xi32> to vector<64x256xi32>
    %67 = vector.broadcast %65 : vector<1x256xi32> to vector<64x256xi32>
    %68 = arith.cmpi eq, %66, %67 : vector<64x256xi32>
    %69 = arith.extui %68 : vector<64x256xi1> to vector<64x256xi32>
    %70 = arith.sitofp %69 : vector<64x256xi32> to vector<64x256xf32>
    %71 = arith.addf %48, %70 : vector<64x256xf32>
    %cst_17 = arith.constant 0x7F800000 : f32
    %72 = vector.broadcast %cst_17 : f32 to vector<64x256xf32>
    %73 = arith.select %68, %72, %50 : vector<64x256xi1>, vector<64x256xf32>
    %c2_i32 = arith.constant 2 : i32
    %74 = vector.broadcast %c2_i32 : i32 to vector<8x256xi32>
    %75 = arith.cmpi eq, %7, %74 : vector<8x256xi32>
    %76 = vector.shape_cast %65 : vector<1x256xi32> to vector<1x256xi32>
    %77 = vector.broadcast %76 : vector<1x256xi32> to vector<8x256xi32>
    %78 = arith.select %75, %77, %55 : vector<8x256xi1>, vector<8x256xi32>
    %cst_18 = arith.constant dense<0x7F800000> : vector<256xf32>
    %79 = vector.multi_reduction <minimumf>, %73, %cst_18 [0] : vector<64x256xf32> to vector<256xf32>
    %80 = vector.shape_cast %79 : vector<256xf32> to vector<1x256xf32>
    %81 = vector.broadcast %80 : vector<1x256xf32> to vector<64x256xf32>
    %82 = arith.cmpf oeq, %73, %81 : vector<64x256xf32>
    %c64_i32_19 = arith.constant 64 : i32
    %83 = vector.shape_cast %6 : vector<64x1xi32> to vector<64x1xi32>
    %84 = vector.broadcast %83 : vector<64x1xi32> to vector<64x256xi32>
    %85 = vector.broadcast %c64_i32_19 : i32 to vector<64x256xi32>
    %86 = arith.select %82, %84, %85 : vector<64x256xi1>, vector<64x256xi32>
    %cst_20 = arith.constant dense<2147483647> : vector<256xi32>
    %87 = vector.multi_reduction <minsi>, %86, %cst_20 [0] : vector<64x256xi32> to vector<256xi32>
    %88 = vector.shape_cast %87 : vector<256xi32> to vector<1x256xi32>
    %89 = vector.broadcast %6 : vector<64x1xi32> to vector<64x256xi32>
    %90 = vector.broadcast %88 : vector<1x256xi32> to vector<64x256xi32>
    %91 = arith.cmpi eq, %89, %90 : vector<64x256xi32>
    %92 = arith.extui %91 : vector<64x256xi1> to vector<64x256xi32>
    %93 = arith.sitofp %92 : vector<64x256xi32> to vector<64x256xf32>
    %94 = arith.addf %71, %93 : vector<64x256xf32>
    %cst_21 = arith.constant 0x7F800000 : f32
    %95 = vector.broadcast %cst_21 : f32 to vector<64x256xf32>
    %96 = arith.select %91, %95, %73 : vector<64x256xi1>, vector<64x256xf32>
    %c3_i32 = arith.constant 3 : i32
    %97 = vector.broadcast %c3_i32 : i32 to vector<8x256xi32>
    %98 = arith.cmpi eq, %7, %97 : vector<8x256xi32>
    %99 = vector.shape_cast %88 : vector<1x256xi32> to vector<1x256xi32>
    %100 = vector.broadcast %99 : vector<1x256xi32> to vector<8x256xi32>
    %101 = arith.select %98, %100, %78 : vector<8x256xi1>, vector<8x256xi32>
    %cst_22 = arith.constant dense<0x7F800000> : vector<256xf32>
    %102 = vector.multi_reduction <minimumf>, %96, %cst_22 [0] : vector<64x256xf32> to vector<256xf32>
    %103 = vector.shape_cast %102 : vector<256xf32> to vector<1x256xf32>
    %104 = vector.broadcast %103 : vector<1x256xf32> to vector<64x256xf32>
    %105 = arith.cmpf oeq, %96, %104 : vector<64x256xf32>
    %c64_i32_23 = arith.constant 64 : i32
    %106 = vector.shape_cast %6 : vector<64x1xi32> to vector<64x1xi32>
    %107 = vector.broadcast %106 : vector<64x1xi32> to vector<64x256xi32>
    %108 = vector.broadcast %c64_i32_23 : i32 to vector<64x256xi32>
    %109 = arith.select %105, %107, %108 : vector<64x256xi1>, vector<64x256xi32>
    %cst_24 = arith.constant dense<2147483647> : vector<256xi32>
    %110 = vector.multi_reduction <minsi>, %109, %cst_24 [0] : vector<64x256xi32> to vector<256xi32>
    %111 = vector.shape_cast %110 : vector<256xi32> to vector<1x256xi32>
    %112 = vector.broadcast %6 : vector<64x1xi32> to vector<64x256xi32>
    %113 = vector.broadcast %111 : vector<1x256xi32> to vector<64x256xi32>
    %114 = arith.cmpi eq, %112, %113 : vector<64x256xi32>
    %115 = arith.extui %114 : vector<64x256xi1> to vector<64x256xi32>
    %116 = arith.sitofp %115 : vector<64x256xi32> to vector<64x256xf32>
    %117 = arith.addf %94, %116 : vector<64x256xf32>
    %c4_i32 = arith.constant 4 : i32
    %118 = vector.broadcast %c4_i32 : i32 to vector<8x256xi32>
    %119 = arith.cmpi eq, %7, %118 : vector<8x256xi32>
    %120 = vector.shape_cast %111 : vector<1x256xi32> to vector<1x256xi32>
    %121 = vector.broadcast %120 : vector<1x256xi32> to vector<8x256xi32>
    %122 = arith.select %119, %121, %101 : vector<8x256xi1>, vector<8x256xi32>
    %cst_25 = arith.constant dense<0.000000e+00> : vector<32x256xf32>
    %123 = tpu.matmul %1, %117, %cst_25 {dimension_numbers = #tpu.dot_dimension_numbers<[0], [0], [1], [1], [0, 1, 1, 1], [], []>} : vector<64x32xf32>, vector<64x256xf32>, vector<32x256xf32> -> vector<32x256xf32>
    %cst_26 = arith.constant 2.000000e-01 : f32
    %124 = vector.broadcast %cst_26 : f32 to vector<32x256xf32>
    %125 = arith.mulf %123, %124 : vector<32x256xf32>
    %c0_27 = arith.constant 0 : index
    %c0_28 = arith.constant 0 : index
    %126 = vector.load %arg4[%c0_27, %c0_28] : memref<32x256xf32, #tpu.memory_space<vmem>>, vector<32x256xf32>
    tpu.vector_store %arg4[%c0_27, %c0_28], %125 {strides = array<i32>} : memref<32x256xf32, #tpu.memory_space<vmem>>, vector<32x256xf32>,
    %c0_29 = arith.constant 0 : index
    %c0_30 = arith.constant 0 : index
    %127 = vector.load %arg5[%c0_29, %c0_30] : memref<8x256xi32, #tpu.memory_space<vmem>>, vector<8x256xi32>
    tpu.vector_store %arg5[%c0_29, %c0_30], %122 {strides = array<i32>} : memref<8x256xi32, #tpu.memory_space<vmem>>, vector<8x256xi32>,
    %128 = arith.subf %125, %0 : vector<32x256xf32>
    %129 = arith.mulf %128, %128 : vector<32x256xf32>
    %cst_31 = arith.constant dense<0.000000e+00> : vector<256xf32>
    %130 = vector.multi_reduction <add>, %129, %cst_31 [0] : vector<32x256xf32> to vector<256xf32>
    %131 = vector.shape_cast %130 : vector<256xf32> to vector<1x256xf32>
    %c0_32 = arith.constant 0 : index
    %c0_33 = arith.constant 0 : index
    %132 = vector.load %arg6[%c0_32, %c0_33] : memref<1x256xf32, #tpu.memory_space<vmem>>, vector<1x256xf32>
    tpu.vector_store %arg6[%c0_32, %c0_33], %131 {strides = array<i32>} : memref<1x256xf32, #tpu.memory_space<vmem>>, vector<1x256xf32>,
    return
  }
  func.func @transform_0(%arg0: i32) -> (i32, i32) {
    %c0_i32 = arith.constant 0 : i32
    %c0_i32_0 = arith.constant 0 : i32
    return %c0_i32, %arg0 : i32, i32
  }
  func.func @transform_1(%arg0: i32) -> (i32, i32) {
    %c0_i32 = arith.constant 0 : i32
    %c0_i32_0 = arith.constant 0 : i32
    %c0_i32_1 = arith.constant 0 : i32
    return %c0_i32, %c0_i32_0 : i32, i32
  }
  func.func @transform_2(%arg0: i32) -> (i32, i32) {
    %c0_i32 = arith.constant 0 : i32
    %c0_i32_0 = arith.constant 0 : i32
    %c0_i32_1 = arith.constant 0 : i32
    return %c0_i32, %c0_i32_0 : i32, i32
  }
  func.func @transform_3(%arg0: i32) -> (i32, i32) {
    %c0_i32 = arith.constant 0 : i32
    %c0_i32_0 = arith.constant 0 : i32
    return %c0_i32, %arg0 : i32, i32
  }
  func.func @transform_4(%arg0: i32) -> (i32, i32) {
    %c0_i32 = arith.constant 0 : i32
    %c0_i32_0 = arith.constant 0 : i32
    return %c0_i32, %arg0 : i32, i32
  }
  func.func @transform_5(%arg0: i32) -> (i32, i32) {
    %c0_i32 = arith.constant 0 : i32
    %c0_i32_0 = arith.constant 0 : i32
    return %c0_i32, %arg0 : i32, i32
  }
}

</mosaic_0001>

<bundles_post_ra>
// kernel: tpu_custom_call.1
= control target key start
LH: loop header
LB: loop body
LE: loop exit
PB: predicated region body
PF: predicated region fallthrough
CT: control target
= control target key end

     0   :  { %11 = vsyncpa [#allocation4], 0  ;;  %s3740_s0 = inlined_call_operand.vmem [shape: f32[32,512], index: 0, kind: input, shape index: {}]   ;;  %s3741_s1 = inlined_call_operand.vmem [shape: f32[64,32], index: 1, kind: input, shape index: {}]   ;;  %s3742_s2 = inlined_call_operand.vmem [shape: f32[64,1], index: 2, kind: input, shape index: {}]   ;;  %s3743_s3 = inlined_call_operand.hbm [shape: f32[32,512], index: 3, kind: output, shape index: {0}]   ;;  %s3744_s4 = inlined_call_operand.hbm [shape: s32[8,512], index: 4, kind: output, shape index: {1}]   ;;  %s3745_s5 = inlined_call_operand.hbm [shape: f32[1,512], index: 5, kind: output, shape index: {2}]  }
   0x1   :  { %13 = vsyncpa [#allocation4 + $0x1], 0 }
   0x2   :  { %14 = vsyncpa [#allocation6], 0 }
   0x3   :  { %16 = vsyncpa [#allocation6 + $0x1], 0  ;;  %s2185_s18 = smov 0   ;;  %s2187_s19 = smov 0  }
   0x4   :  { %s2189_s20 = smov 0   ;;  %s2191_s21 = smov 0  }
   0x5 LB: > { %s2206_s22 = sadd.s32 4294967295, %s2144_s21   ;;  %s1815_s23 = sadd.s32 4294967294, %s2144_s21   ;;  %s2144_s21 = sphi %s2191_s21, %s3783_s21   ;;  %s2140_s20 = sphi %s2189_s20, %s3782_s20   ;;  %s2136_s19 = sphi %s2187_s19, %s3781_s19   ;;  %s2132_s18 = sphi %s2185_s18, %s3780_s18  }
   0x6   : > { %s2210_s24 = sadd.s32 1, %s2144_s21   ;;  %s29_s25 = sadd.s32 1, %s2140_s20 }
   0x7   : > { %s26_s26 = ssub.s32 %s2144_s21, %s2210_s24  ;;  %p36_p0 = scmp.ne.s32.totalorder %s2140_s20, %s2136_s19 }
   0x8   : > { %p27_p1 = scmp.eq.s32.totalorder %s26_s26, 0  ;;  %p37_p2 = scmp.eq.s32.totalorder %s2144_s21, 0 }
   0x9   : > { %p108_p3 = scmp.eq.s32.totalorder %s2206_s22, 1  ;;  %p113_p4 = scmp.ne.s32.totalorder %s2136_s19, %s2132_s18 }
   0xa   : > { %s2222_s27 = scalar_select %p27_p1, %s2140_s20, %s29_s25  }
   0xb   : > { %p38_p5 = por %p37_p2, %p36_p0  ;;  %p2224_p6 = por %p108_p3, %p36_p0 }
   0xc   : > { %p114_p7 = scmp.eq.s32.totalorder %s1815_s23, 1  ;;  %p1817_p9 = scmp.ge.s32.totalorder %s2144_s21, 2 }
   0xe   : > { %p2230_p8 = por %p114_p7, %p113_p4  ;;  %188 = sbr.rel (%p1817_p9) target bundleno = 29 (0x1d), region = 24 }
  0x15   : > { %191 = sbr.rel (!%p38_p5) target bundleno = 29 (0x1d), region = 28  ;;  %s193_s30 = sand.u32 (%p38_p5), 1, %s2140_s20  }
  0x16   : > { %s1929_s6 = sshll.u32 (%p38_p5), %s2144_s21, 4  ;;  %s1818_s7 = sshll.u32 (%p38_p5), %s193_s30, 6 }
  0x17   : > { %s198_s10 = scalar_lea.vmem (%p38_p5), %s3740_s0, %s1929_s6  ;;  %s195_s11 = scalar_lea.vmem (%p38_p5), [#allocation2], %s1818_s7 }
  0x18   : > { %v211_v0 = vld [vmem:[%s198_s10] sm:$0xff] (%p38_p5)  ;;  %v213_v1 = vld [vmem:[%s198_s10 + $0x8] sm:$0xff] (%p38_p5) }
  0x19   : > { %v215_v2 = vld [vmem:[%s198_s10 + $0x20] sm:$0xff] (%p38_p5)  ;;  %212 = vst [vmem:[%s195_s11] sm:$0xff] (%p38_p5), %v211_v0  ;;  %214 = vst [vmem:[%s195_s11 + $0x8] sm:$0xff] (%p38_p5), %v213_v1  ;;  %v217_v3 = vld [vmem:[%s198_s10 + $0x28] sm:$0xff] (%p38_p5) }
  0x1a   : > { %216 = vst [vmem:[%s195_s11 + $0x10] sm:$0xff] (%p38_p5), %v215_v2  ;;  %v219_v4 = vld [vmem:[%s198_s10 + $0x40] sm:$0xff] (%p38_p5)  ;;  %v221_v5 = vld [vmem:[%s198_s10 + $0x48] sm:$0xff] (%p38_p5)  ;;  %218 = vst [vmem:[%s195_s11 + $0x18] sm:$0xff] (%p38_p5), %v217_v3 }
  0x1b   : > { %220 = vst [vmem:[%s195_s11 + $0x20] sm:$0xff] (%p38_p5), %v219_v4  ;;  %222 = vst [vmem:[%s195_s11 + $0x28] sm:$0xff] (%p38_p5), %v221_v5  ;;  %v223_v6 = vld [vmem:[%s198_s10 + $0x60] sm:$0xff] (%p38_p5)  ;;  %v225_v7 = vld [vmem:[%s198_s10 + $0x68] sm:$0xff] (%p38_p5) }
  0x1c   : > { %224 = vst [vmem:[%s195_s11 + $0x30] sm:$0xff] %v223_v6  ;;  %226 = vst [vmem:[%s195_s11 + $0x38] sm:$0xff] %v225_v7 }
  0x1d PF: > { %p1821_p10 = scmp.ge.s32.totalorder %s2144_s21, 1  ;;  %p231_p11 = scmp.lt.s32.totalorder %s2144_s21, 3 }
  0x1f   : > { %p232_p12 = pnand %p1821_p10, %p231_p11 }
  0x20   : > { %s2245_s12 = sand.u32 (!%p232_p12), 1, %s2136_s19   ;;  %v2146_v8 = vmov (!%p232_p12), 0.0   ;;  %v2147_v9 = vmov (!%p232_p12), 0   ;;  %v295_v10 = vld [vmem:[%s3742_s2] sm:$0xff] (!%p232_p12)  ;;  %v296_v22 = vld [vmem:[%s3742_s2 + $0x8] sm:$0xff] (!%p232_p12)  ;;  %v297_v23 = vld [vmem:[%s3742_s2 + $0x10] sm:$0xff] (!%p232_p12) }
  0x21   : > { %235 = sbr.rel (%p232_p12) target bundleno = 846 (0x34e), region = 51  ;;  %s1822_s13 = sshll.u32 (!%p232_p12), %s2245_s12, 6  ;;  %392 = vmatprep.mubr.f32.mxu0 (!%p232_p12), %v2146_v8  ;;  %1534 = vmatprep.mubr.f32.mxu1 (!%p232_p12), %v2146_v8  ;;  %v299_v25 = vld [vmem:[%s3742_s2 + $0x20] sm:$0xff] (!%p232_p12)  ;;  %v298_v26 = vld [vmem:[%s3742_s2 + $0x18] sm:$0xff] (!%p232_p12)  ;;  %vm303_vm0 = vcmask (!%p232_p12), 261120   ;;  %v301_v28 = vld [vmem:[%s3742_s2 + $0x30] sm:$0xff] (!%p232_p12) }
  0x22   : > { %2012 = vset.pattern.permute.xlu0 (!%p232_p12), %v2147_v9  ;;  %2013 = vset.pattern.permute.xlu1 (!%p232_p12), %v2147_v9  ;;  %s2255_s16 = scalar_lea.vmem (!%p232_p12), [#allocation2], %s1822_s13  ;;  %v287_v27 = vld [vmem:[%s3741_s1] sm:$0xff] (!%p232_p12)  ;;  %v300_v29 = vld [vmem:[%s3742_s2 + $0x28] sm:$0xff] (!%p232_p12)  ;;  %v302_v31 = vld [vmem:[%s3742_s2 + $0x38] sm:$0xff] (!%p232_p12)  ;;  %s1824_s8 = sshll.u32 (!%p232_p12), %s2245_s12, 4 }
  0x23   : > { %v280_v11 = vld [vmem:[%s2255_s16 + $0x8] sm:$0xff] (!%p232_p12)  ;;  %v282_v12 = vld [vmem:[%s2255_s16 + $0x18] sm:$0xff] (!%p232_p12)  ;;  %v279_v13 = vld [vmem:[%s2255_s16] sm:$0xff] (!%p232_p12)  ;;  %443 = vperm.xlu0 (!%p232_p12), %2012, %v295_v10   ;;  %453 = vperm.xlu1 (!%p232_p12), %2013, %v297_v23   ;;  %s267_s9 = scalar_lea.vmem (!%p232_p12), [#allocation5], %s1824_s8  ;;  %s1639_s10 = sand.u32 (!%p232_p12), 1, %s2206_s22  }
  0x24   : > { %v1933_v14 = vpack.c.bf16 (!%p232_p12), %v282_v12, %v280_v11  ;;  %v281_v15 = vld [vmem:[%s2255_s16 + $0x10] sm:$0xff] (!%p232_p12)  ;;  %v284_v16 = vld [vmem:[%s2255_s16 + $0x28] sm:$0xff] (!%p232_p12)  ;;  %v286_v17 = vld [vmem:[%s2255_s16 + $0x38] sm:$0xff] (!%p232_p12)  ;;  %s1930_s11 = sshll.u32 (!%p232_p12), %s2206_s22, 8  ;;  %s1675_s25 = sshll.u32 (!%p232_p12), %s267_s9, 4  ;;  %s1676_s25 = int_to_ptr.vmem [resolvable:$true] %s1675_s25 }
  0x25   : > { %v1935_v18 = vpack.c.bf16 (!%p232_p12), %v281_v15, %v279_v13  ;;  %v1937_v19 = vpack.c.bf16 (!%p232_p12), %v286_v17, %v284_v16  ;;  %v283_v20 = vld [vmem:[%s2255_s16 + $0x20] sm:$0xff] (!%p232_p12)  ;;  %v285_v21 = vld [vmem:[%s2255_s16 + $0x30] sm:$0xff] (!%p232_p12)  ;;  %v288_v30 = vld [vmem:[%s3741_s1 + $0x8] sm:$0xff] (!%p232_p12)  ;;  %s3617_s17 = scalar_lea.hbm (!%p232_p12), %s3744_s4, %s1930_s11  ;;  %s3619_s26 = scalar_lea.sflag (!%p232_p12), [#allocation6], %s1639_s10 }
  0x26   : > { %1934 = vmatprep.subr.bf16.mxu0 (!%p232_p12), %v1933_v14  ;;  %v1939_v24 = vpack.c.bf16 (!%p232_p12), %v285_v21, %v283_v20  ;;  %v289_v32 = vld [vmem:[%s3741_s1 + $0x10] sm:$0xff] (!%p232_p12)  ;;  %v290_v33 = vld [vmem:[%s3741_s1 + $0x18] sm:$0xff] (!%p232_p12)  ;;  %v291_v34 = vld [vmem:[%s3741_s1 + $0x20] sm:$0xff] (!%p232_p12)  ;;  %s2022_s30 = scalar_lea.vmem (!%p232_p12), %s1676_s25, 256  ;;  %s2148_s6 = smov (!%p232_p12), [#allocation5]  }
  0x27   : > { %1936 = vmatpush1.bf16.msra.mxu0 (!%p232_p12), %v1935_v18  ;;  %448 = vperm.xlu0 (!%p232_p12), %2012, %v296_v22   ;;  %v292_v35 = vld [vmem:[%s3741_s1 + $0x28] sm:$0xff] (!%p232_p12)  ;;  %v293_v36 = vld [vmem:[%s3741_s1 + $0x30] sm:$0xff] (!%p232_p12)  ;;  %v294_v37 = vld [vmem:[%s3741_s1 + $0x38] sm:$0xff] (!%p232_p12)  ;;  %p2023_p13 = scmp.ne.s32.totalorder (!%p232_p12), %s1676_s25, %s2022_s30  ;;  %s2026_s7 = sshll.u32 (!%p232_p12), %s2148_s6, 4  ;;  %s2027_s7 = int_to_ptr.vmem [resolvable:$false] %s2026_s7 }
  0x28   : > { %1938 = vmatprep.subr.bf16.mxu0 %v1937_v19  ;;  %458 = vperm.xlu1 %2013, %v298_v26   ;;  %s2028_s8 = scalar_lea.vmem %s2027_s7, 512  ;;  %p2029_p2 = scmp.lt.s32.totalorder %s1676_s25, %s2027_s7 }
  0x29   : > { %p2024_p0 = pnand %p2023_p13, %p2224_p6  ;;  %p2030_p3 = scmp.lt.s32.totalorder %s2028_s8, %s2022_s30 }
  0x2b   : > { %1940 = vmatpush1.bf16.msra.mxu0 %v1939_v24  ;;  %463 = vperm.xlu0 %2012, %v299_v25   ;;  %p2025_p1 = pneg %p2024_p0  ;;  %p2031_p4 = por %p2030_p3, %p2029_p2 }
  0x2c   : > { %468 = vperm.xlu1 %2013, %v300_v29  }
  0x2d   : > { %p2032_p5 = pnand %p2031_p4, %p2025_p1 }
  0x2e   : > { %1826 = vmatmul.mubr.msk.f32.vlgmr.msra.gmra.mrb[0].mxu0 %vm303_vm0, %v287_v27 }
  0x2f   : > { %398 = vmatprep.mubr.f32.mxu0 %v2146_v8  ;;  %473 = vperm.xlu0 %2012, %v301_v28  }
  0x30   : > { %478 = vperm.xlu1 %2013, %v302_v31  }
  0x32   : > { %1827 = vmatmul.mubr.msk.f32.gmra.mrb[2].mxu0 %vm303_vm0, %v288_v30 }
  0x33   : > { %404 = vmatprep.mubr.f32.mxu0 %v2146_v8 }
  0x36   : > { %1828 = vmatmul.mubr.msk.f32.gmra.mrb[4].mxu0 %vm303_vm0, %v289_v32 }
  0x37   : > { %410 = vmatprep.mubr.f32.mxu0 %v2146_v8 }
  0x3a   : > { %1829 = vmatmul.mubr.msk.f32.gmra.mrb[6].mxu0 %vm303_vm0, %v290_v33 }
  0x3b   : > { %416 = vmatprep.mubr.f32.mxu0 %v2146_v8 }
  0x3e   : > { %1830 = vmatmul.mubr.msk.f32.gmra.mrb[8].mxu0 %vm303_vm0, %v291_v34 }
  0x3f   : > { %422 = vmatprep.mubr.f32.mxu0 %v2146_v8 }
  0x42   : > { %1831 = vmatmul.mubr.msk.f32.gmra.mrb[10].mxu0 %vm303_vm0, %v292_v35 }
  0x43   : > { %428 = vmatprep.mubr.f32.mxu0 %v2146_v8 }
  0x46   : > { %1832 = vmatmul.mubr.msk.f32.gmra.mrb[12].mxu0 %vm303_vm0, %v293_v36 }
  0x47   : > { %434 = vmatprep.mubr.f32.mxu0 %v2146_v8 }
  0x4a   : > { %1833 = vmatmul.mubr.msk.f32.gmra.mrb[14].mxu0 %vm303_vm0, %v294_v37 }
  0x4d   : > { %1425 = vxpose.xlu0.b32.start [1/8] (short) (narrow) %v287_v27, 32 }
  0x51   : > { %1426 = vxpose.xlu0.b32.cont [2/8] (short) (narrow) %v288_v30, 32  ;;  %v497_v30 = vlaneseq }
  0x55   : > { %1427 = vxpose.xlu0.b32.cont [3/8] (short) (narrow) %v289_v32, 32 }
  0x59   : > { %1428 = vxpose.xlu0.b32.cont [4/8] (short) (narrow) %v290_v33, 32 }
  0x5d   : > { %1429 = vxpose.xlu0.b32.cont [5/8] (short) (narrow) %v291_v34, 32 }
  0x61   : > { %1430 = vxpose.xlu0.b32.cont [6/8] (short) (narrow) %v292_v35, 32  ;;  %v2374_v35 = vshrl.u32 %v497_v30, 7 }
  0x65   : > { %1431 = vxpose.xlu0.b32.cont [7/8] (short) (narrow) %v293_v36, 32 }
  0x69   : > { %1432 = vxpose.xlu0.b32.end [8/8] (short) (narrow) %v294_v37, 32 }
  0xa2   : > { %v444_v40 = vpop.permute.xlu0 %443  ;;  %v454_v43 = vpop.permute.xlu1 %453 }
  0xa6   : > { %v449_v49 = vpop.permute.xlu0 %448 }
  0xa7   : > { %v459_v52 = vpop.permute.xlu1 %458 }
  0xaa   : > { %v464_v61 = vpop.permute.xlu0 %463 }
  0xab   : > { %v469_v4 = vpop.permute.xlu1 %468 }
  0xae   : > { %v474_v12 = vpop.permute.xlu0 %473 }
  0xaf   : > { %v479_v19 = vpop.permute.xlu1 %478 }
 0x101   : > { %v394_v38 = vpop.f32.mrb[0].mxu0 }
 0x102   : > { %v396_v39 = vpop.f32.mrb[1].mxu0  ;;  %v2325_v45 = vsub.f32 %v444_v40, %v394_v38 }
 0x103   : > { %v2329_v48 = vsub.f32 %v444_v40, %v396_v39  ;;  %v2377_v40 = vadd.s32 8, %v2374_v35 }
 0x105   : > { %v400_v41 = vpop.f32.mrb[2].mxu0 }
 0x106   : > { %v402_v42 = vpop.f32.mrb[3].mxu0  ;;  %v2337_v55 = vsub.f32 %v449_v49, %v400_v41 }
 0x107   : > { %v2341_v58 = vsub.f32 %v449_v49, %v402_v42  ;;  %v2380_v42 = vadd.s32 16, %v2374_v35  ;;  %v2389_v49 = vadd.s32 40, %v2374_v35 }
 0x109   : > { %v406_v44 = vpop.f32.mrb[4].mxu0 }
 0x10a   : > { %v2327_v46 = vsub.f32 %v454_v43, %v406_v44  ;;  %v408_v47 = vpop.f32.mrb[5].mxu0  ;;  %v2386_v44 = vadd.s32 32, %v2374_v35 }
 0x10b   : > { %v2331_v50 = vsub.f32 %v454_v43, %v408_v47  ;;  %v2383_v43 = vadd.s32 24, %v2374_v35 }
 0x10c   : > { %v506_v51 = vmin.f32 %v2325_v45, %v2327_v46 }
 0x10d   : > { %v519_v53 = vmin.f32 %v2329_v48, %v2331_v50  ;;  %v412_v54 = vpop.f32.mrb[6].mxu0 }
 0x10e   : > { %v2339_v56 = vsub.f32 %v459_v52, %v412_v54  ;;  %v414_v57 = vpop.f32.mrb[7].mxu0 }
 0x10f   : > { %v2343_v59 = vsub.f32 %v459_v52, %v414_v57  ;;  %v2395_v52 = vadd.s32 56, %v2374_v35 }
 0x110   : > { %v507_v60 = vmin.f32 %v2337_v55, %v2339_v56 }
 0x111   : > { %v520_v62 = vmin.f32 %v2341_v58, %v2343_v59  ;;  %v418_v63 = vpop.f32.mrb[8].mxu0 }
 0x112   : > { %v2349_v0 = vsub.f32 %v464_v61, %v418_v63  ;;  %v420_v1 = vpop.f32.mrb[9].mxu0 }
 0x113   : > { %v2351_v2 = vsub.f32 %v464_v61, %v420_v1 }
 0x114   : > { %v508_v3 = vmin.f32 %v506_v51, %v2349_v0  ;;  %v2392_v51 = vadd.s32 48, %v2374_v35 }
 0x115   : > { %v521_v5 = vmin.f32 %v519_v53, %v2351_v2  ;;  %v424_v6 = vpop.f32.mrb[10].mxu0 }
 0x116   : > { %v2355_v7 = vsub.f32 %v469_v4, %v424_v6  ;;  %v426_v9 = vpop.f32.mrb[11].mxu0 }
 0x117   : > { %v2357_v10 = vsub.f32 %v469_v4, %v426_v9 }
 0x118   : > { %v509_v11 = vmin.f32 %v507_v60, %v2355_v7 }
 0x119   : > { %v522_v13 = vmin.f32 %v520_v62, %v2357_v10  ;;  %v430_v14 = vpop.f32.mrb[12].mxu0 }
 0x11a   : > { %v2361_v15 = vsub.f32 %v474_v12, %v430_v14  ;;  %v432_v16 = vpop.f32.mrb[13].mxu0 }
 0x11b   : > { %v2363_v17 = vsub.f32 %v474_v12, %v432_v16 }
 0x11c   : > { %v510_v18 = vmin.f32 %v508_v3, %v2361_v15 }
 0x11d   : > { %v523_v20 = vmin.f32 %v521_v5, %v2363_v17  ;;  %v436_v21 = vpop.f32.mrb[14].mxu0 }
 0x11e   : > { %v2367_v22 = vsub.f32 %v479_v19, %v436_v21  ;;  %v438_v23 = vpop.f32.mrb[15].mxu0 }
 0x11f   : > { %v2369_v24 = vsub.f32 %v479_v19, %v438_v23 }
 0x120   : > { %v511_v25 = vmin.f32 %v509_v11, %v2367_v22 }
 0x121   : > { %v524_v26 = vmin.f32 %v522_v13, %v2369_v24 }
 0x122   : > { %v512_v27 = vmin.f32 %v510_v18, %v511_v25 }
 0x123   : > { %v525_v28 = vmin.f32 %v523_v20, %v524_v26 }
 0x124   : > { %v513_v29 = vrot.slane %v512_v27, 4 }
 0x125   : > { %v526_v31 = vrot.slane %v525_v28, 4 }
 0x126   : > { %v514_v32 = vmin.f32 %v512_v27, %v513_v29 }
 0x127   : > { %v527_v33 = vmin.f32 %v525_v28, %v526_v31 }
 0x128   : > { %v515_v34 = vrot.slane %v514_v32, 2 }
 0x129   : > { %v528_v36 = vrot.slane %v527_v33, 2 }
 0x12a   : > { %v516_v37 = vmin.f32 %v514_v32, %v515_v34 }
 0x12b   : > { %v529_v38 = vmin.f32 %v527_v33, %v528_v36 }
 0x12c   : > { %v517_v39 = vrot.slane %v516_v37, 1 }
 0x12d   : > { %v530_v41 = vrot.slane %v529_v38, 1 }
 0x12e   : > { %v518_v47 = vmin.f32 %v516_v37, %v517_v39 }
 0x12f   : > { %v531_v53 = vmin.f32 %v529_v38, %v530_v41 }
 0x130   : > { %vm532_vm1 = vcmp.eq.f32.partialorder %v2325_v45, %v518_v47  ;;  %vm534_vm2 = vcmp.eq.f32.partialorder %v2337_v55, %v518_v47  ;;  %vm536_vm3 = vcmp.eq.f32.partialorder %v2327_v46, %v518_v47  ;;  %vm538_vm4 = vcmp.eq.f32.partialorder %v2339_v56, %v518_v47 }
 0x131   : > { %vm540_vm5 = vcmp.eq.f32.partialorder %v2349_v0, %v518_v47  ;;  %vm542_vm6 = vcmp.eq.f32.partialorder %v2355_v7, %v518_v47  ;;  %vm544_vm7 = vcmp.eq.f32.partialorder %v2361_v15, %v518_v47  ;;  %vm546_vm8 = vcmp.eq.f32.partialorder %v2367_v22, %v518_v47 }
 0x132   : > { %v548_v54 = vsel %vm532_vm1, %v2374_v35, 64  ;;  %v550_v57 = vsel %vm534_vm2, %v2377_v40, 64  ;;  %v552_v60 = vsel %vm536_vm3, %v2380_v42, 64  ;;  %v554_v61 = vsel %vm538_vm4, %v2383_v43, 64 }
 0x133   : > { %v556_v62 = vsel %vm540_vm5, %v2386_v44, 64  ;;  %v558_v63 = vsel %vm542_vm6, %v2389_v49, 64  ;;  %v560_v1 = vsel %vm544_vm7, %v2392_v51, 64  ;;  %v562_v3 = vsel %vm546_vm8, %v2395_v52, 64 }
 0x134   : > { %vm564_vm9 = vcmp.lt.s32.totalorder %v548_v54, %v552_v60  ;;  %vm566_vm10 = vcmp.lt.s32.totalorder %v550_v57, %v554_v61  ;;  %vm533_vm11 = vcmp.eq.f32.partialorder %v2329_v48, %v531_v53  ;;  %vm535_vm12 = vcmp.eq.f32.partialorder %v2341_v58, %v531_v53 }
 0x135   : > { %v565_v4 = vsel %vm564_vm9, %v548_v54, %v552_v60  ;;  %v567_v5 = vsel %vm566_vm10, %v550_v57, %v554_v61  ;;  %vm537_vm13 = vcmp.eq.f32.partialorder %v2331_v50, %v531_v53  ;;  %vm539_vm14 = vcmp.eq.f32.partialorder %v2343_v59, %v531_v53 }
 0x136   : > { %vm568_vm15 = vcmp.lt.s32.totalorder %v565_v4, %v556_v62  ;;  %vm570_vm0 = vcmp.lt.s32.totalorder %v567_v5, %v558_v63  ;;  %vm541_vm1 = vcmp.eq.f32.partialorder %v2351_v2, %v531_v53  ;;  %vm543_vm2 = vcmp.eq.f32.partialorder %v2357_v10, %v531_v53 }
 0x137   : > { %v569_v6 = vsel %vm568_vm15, %v565_v4, %v556_v62  ;;  %v571_v9 = vsel %vm570_vm0, %v567_v5, %v558_v63  ;;  %vm545_vm3 = vcmp.eq.f32.partialorder %v2363_v17, %v531_v53  ;;  %vm547_vm4 = vcmp.eq.f32.partialorder %v2369_v24, %v531_v53 }
 0x138   : > { %vm572_vm5 = vcmp.lt.s32.totalorder %v569_v6, %v560_v1  ;;  %vm574_vm6 = vcmp.lt.s32.totalorder %v571_v9, %v562_v3  ;;  %v549_v11 = vsel %vm533_vm11, %v2374_v35, 64  ;;  %v551_v12 = vsel %vm535_vm12, %v2377_v40, 64 }
 0x139   : > { %v573_v13 = vsel %vm572_vm5, %v569_v6, %v560_v1  ;;  %v575_v14 = vsel %vm574_vm6, %v571_v9, %v562_v3  ;;  %v553_v16 = vsel %vm537_vm13, %v2380_v42, 64  ;;  %v555_v18 = vsel %vm539_vm14, %v2383_v43, 64 }
 0x13a   : > { %vm576_vm7 = vcmp.lt.s32.totalorder %v573_v13, %v575_v14  ;;  %v557_v20 = vsel %vm541_vm1, %v2386_v44, 64  ;;  %vm587_vm8 = vcmp.lt.s32.totalorder %v549_v11, %v553_v16  ;;  %vm589_vm9 = vcmp.lt.s32.totalorder %v551_v12, %v555_v18 }
 0x13b   : > { %v577_v19 = vsel %vm576_vm7, %v573_v13, %v575_v14  ;;  %v559_v23 = vsel %vm543_vm2, %v2389_v49, 64  ;;  %v588_v25 = vsel %vm587_vm8, %v549_v11, %v553_v16  ;;  %v590_v26 = vsel %vm589_vm9, %v551_v12, %v555_v18 }
 0x13c   : > { %v578_v21 = vrot.slane %v577_v19, 4  ;;  %v561_v27 = vsel %vm545_vm3, %v2392_v51, 64  ;;  %vm591_vm10 = vcmp.lt.s32.totalorder %v588_v25, %v557_v20  ;;  %vm593_vm11 = vcmp.lt.s32.totalorder %v590_v26, %v559_v23 }
 0x13d   : > { %v563_v28 = vsel %vm547_vm4, %v2395_v52, 64  ;;  %v592_v29 = vsel %vm591_vm10, %v588_v25, %v557_v20  ;;  %v594_v31 = vsel %vm593_vm11, %v590_v26, %v559_v23 }
 0x13e   : > { %vm579_vm12 = vcmp.lt.s32.totalorder %v577_v19, %v578_v21  ;;  %vm595_vm13 = vcmp.lt.s32.totalorder %v592_v29, %v561_v27  ;;  %vm597_vm14 = vcmp.lt.s32.totalorder %v594_v31, %v563_v28 }
 0x13f   : > { %v580_v32 = vsel %vm579_vm12, %v577_v19, %v578_v21  ;;  %v596_v34 = vsel %vm595_vm13, %v592_v29, %v561_v27  ;;  %v598_v36 = vsel %vm597_vm14, %v594_v31, %v563_v28 }
 0x140   : > { %v581_v33 = vrot.slane %v580_v32, 2  ;;  %vm599_vm15 = vcmp.lt.s32.totalorder %v596_v34, %v598_v36 }
 0x141   : > { %v600_v37 = vsel %vm599_vm15, %v596_v34, %v598_v36 }
 0x142   : > { %vm582_vm0 = vcmp.lt.s32.totalorder %v580_v32, %v581_v33  ;;  %v601_v39 = vrot.slane %v600_v37, 4 }
 0x143   : > { %v583_v38 = vsel %vm582_vm0, %v580_v32, %v581_v33 }
 0x144   : > { %v584_v41 = vrot.slane %v583_v38, 1  ;;  %vm602_vm1 = vcmp.lt.s32.totalorder %v600_v37, %v601_v39 }
 0x145   : > { %v603_v47 = vsel %vm602_vm1, %v600_v37, %v601_v39 }
 0x146   : > { %vm585_vm2 = vcmp.lt.s32.totalorder %v583_v38, %v584_v41  ;;  %v604_v53 = vrot.slane %v603_v47, 2 }
 0x147   : > { %v2445_v54 = vsel %vm585_vm2, %v583_v38, %v584_v41 }
 0x148   : > { %vm610_vm3 = vcmp.eq.s32.totalorder %v2374_v35, %v2445_v54  ;;  %vm612_vm4 = vcmp.eq.s32.totalorder %v2377_v40, %v2445_v54  ;;  %vm614_vm5 = vcmp.eq.s32.totalorder %v2380_v42, %v2445_v54  ;;  %vm3757_vm6 = vcmp.eq.s32.totalorder %v2383_v43, %v2445_v54 }
 0x149   : > { %vm3756_vm7 = vcmp.eq.s32.totalorder %v2386_v44, %v2445_v54  ;;  %vm3755_vm8 = vcmp.eq.s32.totalorder %v2389_v49, %v2445_v54  ;;  %vm3754_vm9 = vcmp.eq.s32.totalorder %v2392_v51, %v2445_v54  ;;  %vm624_vm10 = vcmp.eq.s32.totalorder %v2395_v52, %v2445_v54 }
 0x14a   : > { %v2467_v57 = vsel %vm610_vm3, inf, %v2325_v45  ;;  %v2473_v60 = vsel %vm612_vm4, inf, %v2337_v55  ;;  %v2479_v61 = vsel %vm614_vm5, inf, %v2327_v46  ;;  %v2485_v62 = vsel %vm3757_vm6, inf, %v2339_v56 }
 0x14b   : > { %v2491_v45 = vsel %vm3756_vm7, inf, %v2349_v0  ;;  %v2497_v55 = vsel %vm3755_vm8, inf, %v2355_v7  ;;  %v2503_v46 = vsel %vm3754_vm9, inf, %v2361_v15  ;;  %v2509_v56 = vsel %vm624_vm10, inf, %v2367_v22 }
 0x14c   : > { %v693_v0 = vmin.f32 %v2467_v57, %v2479_v61  ;;  %v694_v63 = vmin.f32 %v2473_v60, %v2485_v62  ;;  %vm605_vm11 = vcmp.lt.s32.totalorder %v603_v47, %v604_v53 }
 0x14d   : > { %v606_v7 = vsel %vm605_vm11, %v603_v47, %v604_v53 }
 0x14e   : > { %v695_v1 = vmin.f32 %v693_v0, %v2491_v45  ;;  %v696_v3 = vmin.f32 %v694_v63, %v2497_v55  ;;  %v607_v15 = vrot.slane %v606_v7, 1 }
 0x150   : > { %v697_v4 = vmin.f32 %v695_v1, %v2503_v46  ;;  %v698_v5 = vmin.f32 %v696_v3, %v2509_v56  ;;  %vm608_vm12 = vcmp.lt.s32.totalorder %v606_v7, %v607_v15 }
 0x151   : > { %v2519_v22 = vsel %vm608_vm12, %v606_v7, %v607_v15 }
 0x152   : > { %v699_v6 = vmin.f32 %v697_v4, %v698_v5  ;;  %vm3752_vm13 = vcmp.eq.s32.totalorder %v2374_v35, %v2519_v22  ;;  %vm3751_vm14 = vcmp.eq.s32.totalorder %v2377_v40, %v2519_v22  ;;  %vm3750_vm15 = vcmp.eq.s32.totalorder %v2380_v42, %v2519_v22 }
 0x153   : > { %vm3749_vm0 = vcmp.eq.s32.totalorder %v2383_v43, %v2519_v22  ;;  %vm3748_vm1 = vcmp.eq.s32.totalorder %v2386_v44, %v2519_v22  ;;  %vm3747_vm2 = vcmp.eq.s32.totalorder %v2389_v49, %v2519_v22  ;;  %vm3746_vm11 = vcmp.eq.s32.totalorder %v2392_v51, %v2519_v22 }
 0x154   : > { %v700_v9 = vrot.slane %v699_v6, 4  ;;  %vm3753_vm12 = vcmp.eq.s32.totalorder %v2395_v52, %v2519_v22  ;;  %v2541_v11 = vsel %vm3752_vm13, inf, %v2329_v48  ;;  %v2547_v12 = vsel %vm3751_vm14, inf, %v2341_v58 }
 0x155   : > { %v2553_v13 = vsel %vm3750_vm15, inf, %v2331_v50  ;;  %v2559_v14 = vsel %vm3749_vm0, inf, %v2343_v59  ;;  %v2565_v48 = vsel %vm3748_vm1, inf, %v2351_v2  ;;  %v2571_v16 = vsel %vm3747_vm2, inf, %v2357_v10 }
 0x156   : > { %v701_v58 = vmin.f32 %v699_v6, %v700_v9  ;;  %v2577_v50 = vsel %vm3746_vm11, inf, %v2363_v17  ;;  %v2583_v59 = vsel %vm3753_vm12, inf, %v2369_v24  ;;  %v706_v2 = vmin.f32 %v2541_v11, %v2553_v13 }
 0x157   : > { %v707_v18 = vmin.f32 %v2547_v12, %v2559_v14  ;;  %v1848_v6 = vsel %vm624_vm10, 1.0, %v2146_v8  ;;  %v2621_v9 = vsel %vm610_vm3, 1.0, %v2146_v8 }
 0x158   : > { %v702_v10 = vrot.slane %v701_v58, 2  ;;  %v708_v19 = vmin.f32 %v706_v2, %v2565_v48 }
 0x159   : > { %v709_v20 = vmin.f32 %v707_v18, %v2571_v16 }
 0x15a   : > { %v703_v21 = vmin.f32 %v701_v58, %v702_v10  ;;  %v710_v17 = vmin.f32 %v708_v19, %v2577_v50  ;;  %v2627_v58 = vsel %vm612_vm4, 1.0, %v2146_v8 }
 0x15b   : > { %v711_v23 = vmin.f32 %v709_v20, %v2583_v59 }
 0x15c   : > { %v704_v25 = vrot.slane %v703_v21, 1 }
 0x15d   : > { %v712_v26 = vmin.f32 %v710_v17, %v711_v23  ;;  %v1838_v17 = vsel %vm614_vm5, 1.0, %v2146_v8 }
 0x15e   : > { %v705_v24 = vmin.f32 %v703_v21, %v704_v25 }
 0x15f   : > { %v713_v27 = vrot.slane %v712_v26, 4 }
 0x160   : > { %vm719_vm11 = vcmp.eq.f32.partialorder %v2467_v57, %v705_v24  ;;  %vm721_vm2 = vcmp.eq.f32.partialorder %v2473_v60, %v705_v24  ;;  %vm723_vm1 = vcmp.eq.f32.partialorder %v2479_v61, %v705_v24  ;;  %vm725_vm0 = vcmp.eq.f32.partialorder %v2485_v62, %v705_v24 }
 0x161   : > { %vm727_vm15 = vcmp.eq.f32.partialorder %v2491_v45, %v705_v24  ;;  %vm729_vm14 = vcmp.eq.f32.partialorder %v2497_v55, %v705_v24  ;;  %vm731_vm13 = vcmp.eq.f32.partialorder %v2503_v46, %v705_v24  ;;  %vm733_vm12 = vcmp.eq.f32.partialorder %v2509_v56, %v705_v24 }
 0x162   : > { %v735_v28 = vsel %vm719_vm11, %v2374_v35, 64  ;;  %v737_v29 = vsel %vm721_vm2, %v2377_v40, 64  ;;  %v739_v31 = vsel %vm723_vm1, %v2380_v42, 64  ;;  %v741_v32 = vsel %vm725_vm0, %v2383_v43, 64 }
 0x163   : > { %vm751_vm9 = vcmp.lt.s32.totalorder %v735_v28, %v739_v31  ;;  %vm753_vm8 = vcmp.lt.s32.totalorder %v737_v29, %v741_v32  ;;  %v714_v33 = vmin.f32 %v712_v26, %v713_v27  ;;  %v743_v34 = vsel %vm727_vm15, %v2386_v44, 64 }
 0x164   : > { %v745_v36 = vsel %vm729_vm14, %v2389_v49, 64  ;;  %v752_v37 = vsel %vm751_vm9, %v735_v28, %v739_v31  ;;  %v754_v38 = vsel %vm753_vm8, %v737_v29, %v741_v32  ;;  %v747_v41 = vsel %vm731_vm13, %v2392_v51, 64 }
 0x165   : > { %vm755_vm7 = vcmp.lt.s32.totalorder %v752_v37, %v743_v34  ;;  %vm757_vm6 = vcmp.lt.s32.totalorder %v754_v38, %v745_v36  ;;  %v715_v39 = vrot.slane %v714_v33, 2  ;;  %v749_v47 = vsel %vm733_vm12, %v2395_v52, 64 }
 0x166   : > { %v756_v53 = vsel %vm755_vm7, %v752_v37, %v743_v34  ;;  %v758_v0 = vsel %vm757_vm6, %v754_v38, %v745_v36  ;;  %vm690_vm6 = vcmp.eq.s32.totalorder %v2374_v35, 0  ;;  %vm3764_vm12 = vcmp.eq.s32.totalorder %v2383_v43, %v2445_v54 }
 0x167   : > { %vm759_vm0 = vcmp.lt.s32.totalorder %v756_v53, %v747_v41  ;;  %vm761_vm1 = vcmp.lt.s32.totalorder %v758_v0, %v749_v47  ;;  %v716_v63 = vmin.f32 %v714_v33, %v715_v39  ;;  %v1840_v23 = vsel %vm3764_vm12, 1.0, %v2146_v8 }
 0x168   : > { %v760_v7 = vsel %vm759_vm0, %v756_v53, %v747_v41  ;;  %v762_v1 = vsel %vm761_vm1, %v758_v0, %v749_v47  ;;  %vm3765_vm0 = vcmp.eq.s32.totalorder %v2386_v44, %v2445_v54  ;;  %vm3766_vm1 = vcmp.eq.s32.totalorder %v2389_v49, %v2445_v54 }
 0x169   : > { %vm763_vm9 = vcmp.lt.s32.totalorder %v760_v7, %v762_v1  ;;  %v717_v3 = vrot.slane %v716_v63, 1  ;;  %v2654_v25 = vsel %vm3765_vm0, 1.0, %v2146_v8  ;;  %v2660_v26 = vsel %vm3766_vm1, 1.0, %v2146_v8 }
 0x16a   : > { %v764_v15 = vsel %vm763_vm9, %v760_v7, %v762_v1  ;;  %v691_v41 = vsel %vm690_vm6, %v2445_v54, 0  ;;  %vm3758_vm0 = vcmp.eq.s32.totalorder %v2374_v35, 1 }
 0x16b   : > { %v765_v4 = vrot.slane %v764_v15, 4  ;;  %v718_v5 = vmin.f32 %v716_v63, %v717_v3 }
 0x16d   : > { %vm766_vm7 = vcmp.lt.s32.totalorder %v764_v15, %v765_v4  ;;  %vm720_vm8 = vcmp.eq.f32.partialorder %v2541_v11, %v718_v5  ;;  %vm722_vm13 = vcmp.eq.f32.partialorder %v2547_v12, %v718_v5  ;;  %vm724_vm10 = vcmp.eq.f32.partialorder %v2553_v13, %v718_v5 }
 0x16e   : > { %v767_v2 = vsel %vm766_vm7, %v764_v15, %v765_v4  ;;  %vm726_vm14 = vcmp.eq.f32.partialorder %v2559_v14, %v718_v5  ;;  %vm728_vm3 = vcmp.eq.f32.partialorder %v2565_v48, %v718_v5  ;;  %vm730_vm15 = vcmp.eq.f32.partialorder %v2571_v16, %v718_v5 }
 0x16f   : > { %v768_v18 = vrot.slane %v767_v2, 2  ;;  %vm732_vm4 = vcmp.eq.f32.partialorder %v2577_v50, %v718_v5  ;;  %vm734_vm2 = vcmp.eq.f32.partialorder %v2583_v59, %v718_v5  ;;  %v736_v10 = vsel %vm720_vm8, %v2374_v35, 64 }
 0x170   : > { %v738_v19 = vsel %vm722_vm13, %v2377_v40, 64  ;;  %v740_v20 = vsel %vm724_vm10, %v2380_v42, 64  ;;  %v742_v21 = vsel %vm726_vm14, %v2383_v43, 64  ;;  %v744_v27 = vsel %vm728_vm3, %v2386_v44, 64 }
 0x171   : > { %vm769_vm11 = vcmp.lt.s32.totalorder %v767_v2, %v768_v18  ;;  %vm774_vm5 = vcmp.lt.s32.totalorder %v736_v10, %v740_v20  ;;  %vm776_vm9 = vcmp.lt.s32.totalorder %v738_v19, %v742_v21  ;;  %v746_v29 = vsel %vm730_vm15, %v2389_v49, 64 }
 0x172   : > { %v770_v24 = vsel %vm769_vm11, %v767_v2, %v768_v18  ;;  %v775_v31 = vsel %vm774_vm5, %v736_v10, %v740_v20  ;;  %v777_v32 = vsel %vm776_vm9, %v738_v19, %v742_v21  ;;  %v748_v33 = vsel %vm732_vm4, %v2392_v51, 64 }
 0x173   : > { %v771_v28 = vrot.slane %v770_v24, 1  ;;  %vm778_vm7 = vcmp.lt.s32.totalorder %v775_v31, %v744_v27  ;;  %vm780_vm8 = vcmp.lt.s32.totalorder %v777_v32, %v746_v29  ;;  %vm3767_vm13 = vcmp.eq.s32.totalorder %v2392_v51, %v2445_v54 }
 0x174   : > { %v1846_v34 = vsel %vm3767_vm13, 1.0, %v2146_v8  ;;  %v750_v36 = vsel %vm734_vm2, %v2395_v52, 64  ;;  %v779_v37 = vsel %vm778_vm7, %v775_v31, %v744_v27  ;;  %v781_v38 = vsel %vm780_vm8, %v777_v32, %v746_v29 }
 0x175   : > { %vm772_vm10 = vcmp.lt.s32.totalorder %v770_v24, %v771_v28  ;;  %vm782_vm14 = vcmp.lt.s32.totalorder %v779_v37, %v748_v33  ;;  %vm784_vm3 = vcmp.lt.s32.totalorder %v781_v38, %v750_v36 }
 0x176   : > { %v773_v39 = vsel %vm772_vm10, %v770_v24, %v771_v28  ;;  %v783_v3 = vsel %vm782_vm14, %v779_v37, %v748_v33  ;;  %v785_v15 = vsel %vm784_vm3, %v781_v38, %v750_v36  ;;  %vm3768_vm10 = vcmp.eq.s32.totalorder %v2395_v52, %v2519_v22 }
 0x177   : > { %vm797_vm15 = vcmp.eq.s32.totalorder %v2374_v35, %v773_v39  ;;  %vm799_vm4 = vcmp.eq.s32.totalorder %v2377_v40, %v773_v39  ;;  %vm801_vm11 = vcmp.eq.s32.totalorder %v2380_v42, %v773_v39  ;;  %vm803_vm12 = vcmp.eq.s32.totalorder %v2383_v43, %v773_v39 }
 0x178   : > { %vm805_vm2 = vcmp.eq.s32.totalorder %v2386_v44, %v773_v39  ;;  %vm807_vm1 = vcmp.eq.s32.totalorder %v2389_v49, %v773_v39  ;;  %vm809_vm5 = vcmp.eq.s32.totalorder %v2392_v51, %v773_v39  ;;  %vm811_vm9 = vcmp.eq.s32.totalorder %v2395_v52, %v773_v39 }
 0x179   : > { %v1864_v54 = vsel %vm811_vm9, 1.0, %v2146_v8  ;;  %v2692_v47 = vsel %vm797_vm15, inf, %v2467_v57  ;;  %v2697_v53 = vsel %vm799_vm4, inf, %v2473_v60  ;;  %v2702_v0 = vsel %vm801_vm11, inf, %v2479_v61 }
 0x17a   : > { %v2704_v63 = vadd.f32 %v1864_v54, %v1848_v6  ;;  %v2709_v7 = vsel %vm803_vm12, inf, %v2485_v62  ;;  %v2714_v57 = vsel %vm805_vm2, inf, %v2491_v45  ;;  %v2719_v60 = vsel %vm807_vm1, inf, %v2497_v55 }
 0x17b   : > { %v2724_v61 = vsel %vm809_vm5, inf, %v2503_v46  ;;  %v2727_v1 = vsel %vm811_vm9, inf, %v2509_v56  ;;  %v880_v62 = vmin.f32 %v2692_v47, %v2702_v0  ;;  %v881_v45 = vmin.f32 %v2697_v53, %v2709_v7 }
 0x17c   : > { %v1850_v55 = vsel %vm797_vm15, 1.0, %v2146_v8  ;;  %v1852_v46 = vsel %vm799_vm4, 1.0, %v2146_v8  ;;  %vm786_vm7 = vcmp.lt.s32.totalorder %v783_v3, %v785_v15  ;;  %v1854_v18 = vsel %vm801_vm11, 1.0, %v2146_v8 }
 0x17d   : > { %v882_v56 = vmin.f32 %v880_v62, %v2714_v57  ;;  %v883_v4 = vmin.f32 %v881_v45, %v2719_v60  ;;  %v2744_v5 = vadd.f32 %v1850_v55, %v2621_v9  ;;  %v787_v6 = vsel %vm786_vm7, %v783_v3, %v785_v15 }
 0x17e   : > { %v2747_v2 = vadd.f32 %v1852_v46, %v2627_v58  ;;  %v1856_v10 = vsel %vm803_vm12, 1.0, %v2146_v8  ;;  %v788_v21 = vrot.slane %v787_v6, 4  ;;  %v2757_v24 = vadd.f32 %v1854_v18, %v1838_v17 }
 0x17f   : > { %v884_v19 = vmin.f32 %v882_v56, %v2724_v61  ;;  %v885_v20 = vmin.f32 %v883_v4, %v2727_v1  ;;  %v2759_v9 = vadd.f32 %v1856_v10, %v1840_v23  ;;  %v1858_v58 = vsel %vm805_vm2, 1.0, %v2146_v8 }
 0x180   : > { %v1860_v27 = vsel %vm807_vm1, 1.0, %v2146_v8  ;;  %v1862_v28 = vsel %vm809_vm5, 1.0, %v2146_v8  ;;  %vm789_vm8 = vcmp.lt.s32.totalorder %v787_v6, %v788_v21  ;;  %v2771_v31 = vadd.f32 %v1858_v58, %v2654_v25 }
 0x181   : > { %v886_v29 = vmin.f32 %v884_v19, %v885_v20  ;;  %v2774_v17 = vadd.f32 %v1860_v27, %v2660_v26  ;;  %v790_v23 = vsel %vm789_vm8, %v787_v6, %v788_v21  ;;  %v2776_v32 = vadd.f32 %v1862_v28, %v1846_v34 }
 0x182   : > { %v2780_v33 = vsel %vm3758_vm0, %v773_v39, %v691_v41  ;;  %v791_v37 = vrot.slane %v790_v23, 2  ;;  %v1849_v25 = vsel %vm3768_vm10, 1.0, %v2146_v8  ;;  %vm3769_vm14 = vcmp.eq.s32.totalorder %v2374_v35, %v2519_v22 }
 0x183   : > { %v887_v36 = vrot.slane %v886_v29, 4  ;;  %v2790_v26 = vsel %vm3769_vm14, 1.0, %v2146_v8  ;;  %vm3770_vm3 = vcmp.eq.s32.totalorder %v2377_v40, %v2519_v22  ;;  %vm3771_vm15 = vcmp.eq.s32.totalorder %v2380_v42, %v2519_v22 }
 0x184   : > { %vm792_vm13 = vcmp.lt.s32.totalorder %v790_v23, %v791_v37  ;;  %v2796_v34 = vsel %vm3770_vm3, 1.0, %v2146_v8  ;;  %v2802_v39 = vsel %vm3771_vm15, 1.0, %v2146_v8  ;;  %vm3772_vm11 = vcmp.eq.s32.totalorder %v2383_v43, %v2519_v22 }
 0x185   : > { %v888_v38 = vmin.f32 %v886_v29, %v887_v36  ;;  %v793_v54 = vsel %vm792_vm13, %v790_v23, %v791_v37  ;;  %v2808_v3 = vsel %vm3772_vm11, 1.0, %v2146_v8  ;;  %vm3773_vm12 = vcmp.eq.s32.totalorder %v2386_v44, %v2519_v22 }
 0x186   : > { %v794_v45 = vrot.slane %v793_v54, 1  ;;  %v2814_v15 = vsel %vm3773_vm12, 1.0, %v2146_v8  ;;  %vm3774_vm2 = vcmp.eq.s32.totalorder %v2389_v49, %v2519_v22  ;;  %vm3775_vm1 = vcmp.eq.s32.totalorder %v2392_v51, %v2519_v22 }
 0x187   : > { %v889_v62 = vrot.slane %v888_v38, 2  ;;  %v2822_v46 = vsel %vm3774_vm2, 1.0, %v2146_v8  ;;  %v2828_v56 = vsel %vm3775_vm1, 1.0, %v2146_v8  ;;  %v2833_v4 = vsel %vm690_vm6, %v2519_v22, 0 }
 0x188   : > { %vm795_vm4 = vcmp.lt.s32.totalorder %v793_v54, %v794_v45 }
 0x189   : > { %v890_v41 = vmin.f32 %v888_v38, %v889_v62  ;;  %v2816_v55 = vsel %vm795_vm4, %v793_v54, %v794_v45 }
 0x18a   : > { %vm798_vm5 = vcmp.eq.s32.totalorder %v2374_v35, %v2816_v55  ;;  %vm800_vm9 = vcmp.eq.s32.totalorder %v2377_v40, %v2816_v55  ;;  %vm802_vm7 = vcmp.eq.s32.totalorder %v2380_v42, %v2816_v55  ;;  %vm3760_vm8 = vcmp.eq.s32.totalorder %v2383_v43, %v2816_v55 }
 0x18b   : > { %v891_v6 = vrot.slane %v890_v41, 1  ;;  %vm3759_vm13 = vcmp.eq.s32.totalorder %v2386_v44, %v2816_v55  ;;  %vm808_vm6 = vcmp.eq.s32.totalorder %v2389_v49, %v2816_v55  ;;  %vm810_vm10 = vcmp.eq.s32.totalorder %v2392_v51, %v2816_v55 }
 0x18c   : > { %vm812_vm14 = vcmp.eq.s32.totalorder %v2395_v52, %v2816_v55  ;;  %v2855_v18 = vsel %vm798_vm5, inf, %v2541_v11  ;;  %v2861_v10 = vsel %vm800_vm9, inf, %v2547_v12  ;;  %v2871_v20 = vsel %vm802_vm7, inf, %v2553_v13 }
 0x18d   : > { %v892_v22 = vmin.f32 %v890_v41, %v891_v6  ;;  %v1865_v19 = vsel %vm812_vm14, 1.0, %v2146_v8  ;;  %v2877_v11 = vsel %vm3760_vm8, inf, %v2559_v14  ;;  %v2883_v12 = vsel %vm3759_vm13, inf, %v2565_v48 }
 0x18e   : > { %v2901_v23 = vadd.f32 %v1865_v19, %v1849_v25  ;;  %v2907_v36 = vsel %vm808_vm6, inf, %v2571_v16  ;;  %v2913_v54 = vsel %vm810_vm10, inf, %v2577_v50  ;;  %v2919_v62 = vsel %vm812_vm14, inf, %v2583_v59 }
 0x18f   : > { %vm906_vm3 = vcmp.eq.f32.partialorder %v2692_v47, %v892_v22  ;;  %vm908_vm15 = vcmp.eq.f32.partialorder %v2697_v53, %v892_v22  ;;  %vm910_vm4 = vcmp.eq.f32.partialorder %v2702_v0, %v892_v22  ;;  %vm912_vm11 = vcmp.eq.f32.partialorder %v2709_v7, %v892_v22 }
 0x190   : > { %vm914_vm12 = vcmp.eq.f32.partialorder %v2714_v57, %v892_v22  ;;  %vm916_vm2 = vcmp.eq.f32.partialorder %v2719_v60, %v892_v22  ;;  %vm918_vm1 = vcmp.eq.f32.partialorder %v2724_v61, %v892_v22  ;;  %vm920_vm0 = vcmp.eq.f32.partialorder %v2727_v1, %v892_v22 }
 0x191   : > { %v922_v13 = vsel %vm906_vm3, %v2374_v35, 64  ;;  %v924_v14 = vsel %vm908_vm15, %v2377_v40, 64  ;;  %v926_v48 = vsel %vm910_vm4, %v2380_v42, 64  ;;  %v928_v21 = vsel %vm912_vm11, %v2383_v43, 64 }
 0x192   : > { %v930_v58 = vsel %vm914_vm12, %v2386_v44, 64  ;;  %v932_v27 = vsel %vm916_vm2, %v2389_v49, 64  ;;  %v934_v28 = vsel %vm918_vm1, %v2392_v51, 64  ;;  %v936_v29 = vsel %vm920_vm0, %v2395_v52, 64 }
 0x193   : > { %vm938_vm13 = vcmp.lt.s32.totalorder %v922_v13, %v926_v48  ;;  %vm940_vm8 = vcmp.lt.s32.totalorder %v924_v14, %v928_v21  ;;  %v893_v16 = vmin.f32 %v2855_v18, %v2871_v20  ;;  %v894_v45 = vmin.f32 %v2861_v10, %v2877_v11 }
 0x194   : > { %v939_v37 = vsel %vm938_vm13, %v922_v13, %v926_v48  ;;  %v941_v38 = vsel %vm940_vm8, %v924_v14, %v928_v21  ;;  %v1851_v50 = vsel %vm798_vm5, 1.0, %v2146_v8  ;;  %v1853_v59 = vsel %vm800_vm9, 1.0, %v2146_v8 }
 0x195   : > { %vm942_vm0 = vcmp.lt.s32.totalorder %v939_v37, %v930_v58  ;;  %vm944_vm3 = vcmp.lt.s32.totalorder %v941_v38, %v932_v27  ;;  %v895_v6 = vmin.f32 %v893_v16, %v2883_v12  ;;  %v896_v22 = vmin.f32 %v894_v45, %v2907_v36 }
 0x196   : > { %v943_v25 = vsel %vm942_vm0, %v939_v37, %v930_v58  ;;  %v945_v41 = vsel %vm944_vm3, %v941_v38, %v932_v27  ;;  %v2936_v14 = vadd.f32 %v1851_v50, %v2790_v26  ;;  %v2939_v48 = vadd.f32 %v1853_v59, %v2796_v34 }
 0x197   : > { %vm946_vm8 = vcmp.lt.s32.totalorder %v943_v25, %v934_v28  ;;  %vm948_vm13 = vcmp.lt.s32.totalorder %v945_v41, %v936_v29  ;;  %v897_v21 = vmin.f32 %v895_v6, %v2913_v54  ;;  %v898_v58 = vmin.f32 %v896_v22, %v2919_v62 }
 0x198   : > { %v947_v19 = vsel %vm946_vm8, %v943_v25, %v934_v28  ;;  %v949_v13 = vsel %vm948_vm13, %v945_v41, %v936_v29  ;;  %v1855_v27 = vsel %vm802_vm7, 1.0, %v2146_v8  ;;  %vm3776_vm9 = vcmp.eq.s32.totalorder %v2383_v43, %v2816_v55 }
 0x199   : > { %vm950_vm5 = vcmp.lt.s32.totalorder %v947_v19, %v949_v13  ;;  %v1857_v26 = vsel %vm3776_vm9, 1.0, %v2146_v8  ;;  %v2952_v28 = vadd.f32 %v1855_v27, %v2802_v39  ;;  %vm3777_vm14 = vcmp.eq.s32.totalorder %v2386_v44, %v2816_v55 }
 0x19a   : > { %v951_v37 = vsel %vm950_vm5, %v947_v19, %v949_v13  ;;  %v1859_v34 = vsel %vm3777_vm14, 1.0, %v2146_v8  ;;  %v899_v38 = vmin.f32 %v897_v21, %v898_v58  ;;  %v2959_v16 = vadd.f32 %v1857_v26, %v2808_v3 }
 0x19b   : > { %v952_v29 = vrot.slane %v951_v37, 4  ;;  %v1861_v45 = vsel %vm808_vm6, 1.0, %v2146_v8  ;;  %v2966_v25 = vadd.f32 %v1859_v34, %v2814_v15  ;;  %v1863_v41 = vsel %vm810_vm10, 1.0, %v2146_v8 }
 0x19c   : > { %v2969_v39 = vadd.f32 %v1861_v45, %v2822_v46  ;;  %vm3778_vm7 = vcmp.eq.s32.totalorder %v2374_v35, 1  ;;  %v900_v50 = vrot.slane %v899_v38, 4  ;;  %v2982_v59 = vadd.f32 %v1863_v41, %v2828_v56 }
 0x19d   : > { %v2979_v3 = vsel %vm3778_vm7, %v2816_v55, %v2833_v4  ;;  %vm953_vm15 = vcmp.lt.s32.totalorder %v951_v37, %v952_v29 }
 0x19e   : > { %v954_v15 = vsel %vm953_vm15, %v951_v37, %v952_v29  ;;  %v901_v46 = vmin.f32 %v899_v38, %v900_v50 }
 0x19f   : > { %v955_v6 = vrot.slane %v954_v15, 2 }
 0x1a0   : > { %v902_v22 = vrot.slane %v901_v46, 2 }
 0x1a1   : > { %vm956_vm6 = vcmp.lt.s32.totalorder %v954_v15, %v955_v6 }
 0x1a2   : > { %v957_v19 = vsel %vm956_vm6, %v954_v15, %v955_v6  ;;  %v903_v21 = vmin.f32 %v901_v46, %v902_v22 }
 0x1a3   : > { %v958_v13 = vrot.slane %v957_v19, 1 }
 0x1a4   : > { %v904_v58 = vrot.slane %v903_v21, 1 }
 0x1a5   : > { %vm959_vm10 = vcmp.lt.s32.totalorder %v957_v19, %v958_v13 }
 0x1a6   : > { %v2984_v27 = vsel %vm959_vm10, %v957_v19, %v958_v13  ;;  %v905_v55 = vmin.f32 %v903_v21, %v904_v58 }
 0x1a7   : > { %vm3761_vm4 = vcmp.eq.s32.totalorder %v2395_v52, %v2984_v27  ;;  %vm984_vm11 = vcmp.eq.s32.totalorder %v2374_v35, %v2984_v27  ;;  %vm986_vm12 = vcmp.eq.s32.totalorder %v2377_v40, %v2984_v27  ;;  %vm988_vm2 = vcmp.eq.s32.totalorder %v2380_v42, %v2984_v27 }
 0x1a8   : > { %v2996_v56 = vsel %vm3761_vm4, inf, %v2727_v1  ;;  %vm990_vm1 = vcmp.eq.s32.totalorder %v2383_v43, %v2984_v27  ;;  %vm992_vm0 = vcmp.eq.s32.totalorder %v2386_v44, %v2984_v27  ;;  %vm907_vm3 = vcmp.eq.f32.partialorder %v2855_v18, %v905_v55 }
 0x1a9   : > { %vm909_vm8 = vcmp.eq.f32.partialorder %v2861_v10, %v905_v55  ;;  %vm911_vm13 = vcmp.eq.f32.partialorder %v2871_v20, %v905_v55  ;;  %vm913_vm5 = vcmp.eq.f32.partialorder %v2877_v11, %v905_v55  ;;  %vm915_vm9 = vcmp.eq.f32.partialorder %v2883_v12, %v905_v55 }
 0x1aa   : > { %vm917_vm14 = vcmp.eq.f32.partialorder %v2907_v36, %v905_v55  ;;  %vm919_vm7 = vcmp.eq.f32.partialorder %v2913_v54, %v905_v55  ;;  %vm921_vm15 = vcmp.eq.f32.partialorder %v2919_v62, %v905_v55  ;;  %v923_v1 = vsel %vm907_vm3, %v2374_v35, 64 }
 0x1ab   : > { %v925_v4 = vsel %vm909_vm8, %v2377_v40, 64  ;;  %v927_v37 = vsel %vm911_vm13, %v2380_v42, 64  ;;  %v929_v26 = vsel %vm913_vm5, %v2383_v43, 64  ;;  %v931_v34 = vsel %vm915_vm9, %v2386_v44, 64 }
 0x1ac   : > { %v933_v29 = vsel %vm917_vm14, %v2389_v49, 64  ;;  %v935_v38 = vsel %vm919_vm7, %v2392_v51, 64  ;;  %v937_v45 = vsel %vm921_vm15, %v2395_v52, 64  ;;  %vm961_vm6 = vcmp.lt.s32.totalorder %v923_v1, %v927_v37 }
 0x1ad   : > { %vm963_vm10 = vcmp.lt.s32.totalorder %v925_v4, %v929_v26  ;;  %vm994_vm4 = vcmp.eq.s32.totalorder %v2389_v49, %v2984_v27  ;;  %vm996_vm3 = vcmp.eq.s32.totalorder %v2392_v51, %v2984_v27  ;;  %v962_v41 = vsel %vm961_vm6, %v923_v1, %v927_v37 }
 0x1ae   : > { %v964_v50 = vsel %vm963_vm10, %v925_v4, %v929_v26  ;;  %v1866_v15 = vsel %vm984_vm11, 1.0, %v2146_v8  ;;  %v1868_v6 = vsel %vm986_vm12, 1.0, %v2146_v8  ;;  %vm1064_vm8 = vcmp.eq.s32.totalorder %v2374_v35, 2 }
 0x1af   : > { %vm965_vm13 = vcmp.lt.s32.totalorder %v962_v41, %v931_v34  ;;  %vm967_vm5 = vcmp.lt.s32.totalorder %v964_v50, %v933_v29  ;;  %v3034_v46 = vadd.f32 %v1866_v15, %v2744_v5  ;;  %v3037_v22 = vadd.f32 %v1868_v6, %v2747_v2 }
 0x1b0   : > { %v966_v19 = vsel %vm965_vm13, %v962_v41, %v931_v34  ;;  %v968_v13 = vsel %vm967_vm5, %v964_v50, %v933_v29  ;;  %v3043_v21 = vsel %vm984_vm11, inf, %v2692_v47  ;;  %v3049_v58 = vsel %vm986_vm12, inf, %v2697_v53 }
 0x1b1   : > { %vm969_vm9 = vcmp.lt.s32.totalorder %v966_v19, %v935_v38  ;;  %vm971_vm14 = vcmp.lt.s32.totalorder %v968_v13, %v937_v45  ;;  %v3055_v5 = vsel %vm988_vm2, inf, %v2702_v0  ;;  %v3061_v47 = vsel %vm990_vm1, inf, %v2709_v7 }
 0x1b2   : > { %v970_v2 = vsel %vm969_vm9, %v966_v19, %v935_v38  ;;  %v972_v55 = vsel %vm971_vm14, %v968_v13, %v937_v45  ;;  %v3067_v53 = vsel %vm992_vm0, inf, %v2714_v57  ;;  %v3073_v0 = vsel %vm994_vm4, inf, %v2719_v60 }
 0x1b3   : > { %vm973_vm11 = vcmp.lt.s32.totalorder %v970_v2, %v972_v55  ;;  %v3079_v7 = vsel %vm996_vm3, inf, %v2724_v61  ;;  %v1067_v1 = vmin.f32 %v3043_v21, %v3055_v5  ;;  %v1068_v57 = vmin.f32 %v3049_v58, %v3061_v47 }
 0x1b4   : > { %v974_v4 = vsel %vm973_vm11, %v970_v2, %v972_v55  ;;  %v1870_v60 = vsel %vm988_vm2, 1.0, %v2146_v8  ;;  %v1872_v37 = vsel %vm990_vm1, 1.0, %v2146_v8  ;;  %v1874_v61 = vsel %vm992_vm0, 1.0, %v2146_v8 }
 0x1b5   : > { %v975_v26 = vrot.slane %v974_v4, 4  ;;  %v1069_v34 = vmin.f32 %v1067_v1, %v3067_v53  ;;  %v1070_v29 = vmin.f32 %v1068_v57, %v3073_v0  ;;  %v3100_v38 = vadd.f32 %v1870_v60, %v2757_v24 }
 0x1b6   : > { %v3103_v45 = vadd.f32 %v1872_v37, %v2759_v9  ;;  %v1876_v41 = vsel %vm994_vm4, 1.0, %v2146_v8  ;;  %v3110_v50 = vadd.f32 %v1874_v61, %v2771_v31  ;;  %v1878_v15 = vsel %vm996_vm3, 1.0, %v2146_v8 }
 0x1b7   : > { %vm976_vm12 = vcmp.lt.s32.totalorder %v974_v4, %v975_v26  ;;  %v1071_v24 = vmin.f32 %v1069_v34, %v3079_v7  ;;  %v1072_v6 = vmin.f32 %v1070_v29, %v2996_v56  ;;  %v3119_v9 = vadd.f32 %v1876_v41, %v2774_v17 }
 0x1b8   : > { %v977_v19 = vsel %vm976_vm12, %v974_v4, %v975_v26  ;;  %vm3779_vm4 = vcmp.eq.s32.totalorder %v2395_v52, %v2984_v27  ;;  %v3126_v13 = vadd.f32 %v1878_v15, %v2776_v32  ;;  %v3135_v17 = vsel %vm1064_vm8, %v2984_v27, %v2780_v33 }
 0x1b9   : > { %v1880_v31 = vsel %vm3779_vm4, 1.0, %v2146_v8  ;;  %v978_v2 = vrot.slane %v977_v19, 2  ;;  %v1073_v55 = vmin.f32 %v1071_v24, %v1072_v6 }
 0x1ba   : > { %v3129_v1 = vadd.f32 %v1880_v31, %v2704_v63 }
 0x1bb   : > { %vm979_vm2 = vcmp.lt.s32.totalorder %v977_v19, %v978_v2  ;;  %v1074_v57 = vrot.slane %v1073_v55, 4 }
 0x1bc   : > { %v980_v4 = vsel %vm979_vm2, %v977_v19, %v978_v2 }
 0x1bd   : > { %v981_v60 = vrot.slane %v980_v4, 1  ;;  %v1075_v37 = vmin.f32 %v1073_v55, %v1074_v57 }
 0x1bf   : > { %vm982_vm1 = vcmp.lt.s32.totalorder %v980_v4, %v981_v60  ;;  %v1076_v32 = vrot.slane %v1075_v37, 2 }
 0x1c0   : > { %v983_v61 = vsel %vm982_vm1, %v980_v4, %v981_v60 }
 0x1c1   : > { %vm999_vm0 = vcmp.eq.s32.totalorder %v2395_v52, %v983_v61  ;;  %vm985_vm7 = vcmp.eq.s32.totalorder %v2374_v35, %v983_v61  ;;  %vm987_vm15 = vcmp.eq.s32.totalorder %v2377_v40, %v983_v61  ;;  %vm989_vm6 = vcmp.eq.s32.totalorder %v2380_v42, %v983_v61 }
 0x1c2   : > { %v3144_v63 = vsel %vm999_vm0, inf, %v2919_v62  ;;  %vm991_vm10 = vcmp.eq.s32.totalorder %v2383_v43, %v983_v61  ;;  %vm993_vm3 = vcmp.eq.s32.totalorder %v2386_v44, %v983_v61  ;;  %vm995_vm13 = vcmp.eq.s32.totalorder %v2389_v49, %v983_v61 }
 0x1c3   : > { %vm997_vm5 = vcmp.eq.s32.totalorder %v2392_v51, %v983_v61  ;;  %v1867_v33 = vsel %vm985_vm7, 1.0, %v2146_v8  ;;  %v1869_v27 = vsel %vm987_vm15, 1.0, %v2146_v8  ;;  %v3153_v26 = vsel %vm985_vm7, inf, %v2855_v18 }
 0x1c4   : > { %v3156_v34 = vadd.f32 %v1867_v33, %v2936_v14  ;;  %v3159_v62 = vadd.f32 %v1869_v27, %v2939_v48  ;;  %v3162_v29 = vsel %vm987_vm15, inf, %v2861_v10  ;;  %v3167_v41 = vsel %vm989_vm6, inf, %v2871_v20 }
 0x1c5   : > { %v3172_v15 = vsel %vm991_vm10, inf, %v2877_v11  ;;  %v3177_v18 = vsel %vm993_vm3, inf, %v2883_v12  ;;  %v3182_v10 = vsel %vm995_vm13, inf, %v2907_v36  ;;  %v3187_v20 = vsel %vm997_vm5, inf, %v2913_v54 }
 0x1c6   : > { %v1080_v14 = vmin.f32 %v3153_v26, %v3167_v41  ;;  %v1081_v11 = vmin.f32 %v3162_v29, %v3172_v15  ;;  %v1077_v48 = vmin.f32 %v1075_v37, %v1076_v32  ;;  %v1871_v12 = vsel %vm989_vm6, 1.0, %v2146_v8 }
 0x1c7   : > { %v1873_v36 = vsel %vm991_vm10, 1.0, %v2146_v8  ;;  %v3200_v24 = vadd.f32 %v1871_v12, %v2952_v28  ;;  %v1875_v54 = vsel %vm993_vm3, 1.0, %v2146_v8  ;;  %v1877_v6 = vsel %vm995_vm13, 1.0, %v2146_v8 }
 0x1c8   : > { %v1082_v19 = vmin.f32 %v1080_v14, %v3177_v18  ;;  %v1083_v31 = vmin.f32 %v1081_v11, %v3182_v10  ;;  %v1078_v2 = vrot.slane %v1077_v48, 1  ;;  %v3211_v55 = vadd.f32 %v1873_v36, %v2959_v16 }
 0x1c9   : > { %v3214_v57 = vadd.f32 %v1875_v54, %v2966_v25  ;;  %v3217_v28 = vadd.f32 %v1877_v6, %v2969_v39  ;;  %v1879_v4 = vsel %vm997_vm5, 1.0, %v2146_v8  ;;  %v1881_v60 = vsel %vm999_vm0, 1.0, %v2146_v8 }
 0x1ca   : > { %v1084_v37 = vmin.f32 %v1082_v19, %v3187_v20  ;;  %v1085_v32 = vmin.f32 %v1083_v31, %v3144_v63  ;;  %v1079_v16 = vmin.f32 %v1077_v48, %v1078_v2  ;;  %v3228_v33 = vadd.f32 %v1879_v4, %v2982_v59 }
 0x1cb   : > { %v3231_v25 = vadd.f32 %v1881_v60, %v2901_v23  ;;  %v3236_v39 = vsel %vm1064_vm8, %v983_v61, %v2979_v3 }
 0x1cc   : > { %v1086_v27 = vmin.f32 %v1084_v37, %v1085_v32  ;;  %vm1093_vm9 = vcmp.eq.f32.partialorder %v3043_v21, %v1079_v16  ;;  %vm1095_vm14 = vcmp.eq.f32.partialorder %v3049_v58, %v1079_v16  ;;  %vm1097_vm11 = vcmp.eq.f32.partialorder %v3055_v5, %v1079_v16 }
 0x1cd   : > { %vm1099_vm12 = vcmp.eq.f32.partialorder %v3061_v47, %v1079_v16  ;;  %vm1101_vm4 = vcmp.eq.f32.partialorder %v3067_v53, %v1079_v16  ;;  %vm1103_vm2 = vcmp.eq.f32.partialorder %v3073_v0, %v1079_v16  ;;  %vm1105_vm1 = vcmp.eq.f32.partialorder %v3079_v7, %v1079_v16 }
 0x1ce   : > { %v1087_v23 = vrot.slane %v1086_v27, 4  ;;  %vm1107_vm0 = vcmp.eq.f32.partialorder %v2996_v56, %v1079_v16  ;;  %v1109_v3 = vsel %vm1093_vm9, %v2374_v35, 64  ;;  %v1111_v59 = vsel %vm1095_vm14, %v2377_v40, 64 }
 0x1cf   : > { %v1113_v61 = vsel %vm1097_vm11, %v2380_v42, 64  ;;  %v1115_v14 = vsel %vm1099_vm12, %v2383_v43, 64  ;;  %v1117_v48 = vsel %vm1101_vm4, %v2386_v44, 64  ;;  %v1119_v54 = vsel %vm1103_vm2, %v2389_v49, 64 }
 0x1d0   : > { %v1088_v11 = vmin.f32 %v1086_v27, %v1087_v23  ;;  %vm1125_vm8 = vcmp.lt.s32.totalorder %v1109_v3, %v1113_v61  ;;  %vm1127_vm7 = vcmp.lt.s32.totalorder %v1111_v59, %v1115_v14  ;;  %v1121_v19 = vsel %vm1105_vm1, %v2392_v51, 64 }
 0x1d1   : > { %v1126_v12 = vsel %vm1125_vm8, %v1109_v3, %v1113_v61  ;;  %v1128_v6 = vsel %vm1127_vm7, %v1111_v59, %v1115_v14  ;;  %v1123_v4 = vsel %vm1107_vm0, %v2395_v52, 64 }
 0x1d2   : > { %v1089_v36 = vrot.slane %v1088_v11, 2  ;;  %vm1129_vm15 = vcmp.lt.s32.totalorder %v1126_v12, %v1117_v48  ;;  %vm1131_vm6 = vcmp.lt.s32.totalorder %v1128_v6, %v1119_v54 }
 0x1d3   : > { %v1130_v31 = vsel %vm1129_vm15, %v1126_v12, %v1117_v48  ;;  %v1132_v60 = vsel %vm1131_vm6, %v1128_v6, %v1119_v54 }
 0x1d4   : > { %v1090_v2 = vmin.f32 %v1088_v11, %v1089_v36  ;;  %vm1133_vm10 = vcmp.lt.s32.totalorder %v1130_v31, %v1121_v19  ;;  %vm1135_vm3 = vcmp.lt.s32.totalorder %v1132_v60, %v1123_v4 }
 0x1d5   : > { %v1134_v37 = vsel %vm1133_vm10, %v1130_v31, %v1121_v19  ;;  %v1136_v27 = vsel %vm1135_vm3, %v1132_v60, %v1123_v4 }
 0x1d6   : > { %v1091_v32 = vrot.slane %v1090_v2, 1  ;;  %vm1137_vm13 = vcmp.lt.s32.totalorder %v1134_v37, %v1136_v27 }
 0x1d7   : > { %v1138_v3 = vsel %vm1137_vm13, %v1134_v37, %v1136_v27 }
 0x1d8   : > { %v1092_v23 = vmin.f32 %v1090_v2, %v1091_v32  ;;  %v1139_v59 = vrot.slane %v1138_v3, 4 }
 0x1da   : > { %vm1094_vm5 = vcmp.eq.f32.partialorder %v3153_v26, %v1092_v23  ;;  %vm1096_vm9 = vcmp.eq.f32.partialorder %v3162_v29, %v1092_v23  ;;  %vm1098_vm14 = vcmp.eq.f32.partialorder %v3167_v41, %v1092_v23  ;;  %vm1100_vm11 = vcmp.eq.f32.partialorder %v3172_v15, %v1092_v23 }
 0x1db   : > { %vm1102_vm12 = vcmp.eq.f32.partialorder %v3177_v18, %v1092_v23  ;;  %vm1104_vm4 = vcmp.eq.f32.partialorder %v3182_v10, %v1092_v23  ;;  %vm1106_vm2 = vcmp.eq.f32.partialorder %v3187_v20, %v1092_v23  ;;  %vm1108_vm1 = vcmp.eq.f32.partialorder %v3144_v63, %v1092_v23 }
 0x1dc   : > { %v1110_v16 = vsel %vm1094_vm5, %v2374_v35, 64  ;;  %v1112_v61 = vsel %vm1096_vm9, %v2377_v40, 64  ;;  %v1114_v14 = vsel %vm1098_vm14, %v2380_v42, 64  ;;  %v1116_v11 = vsel %vm1100_vm11, %v2383_v43, 64 }
 0x1dd   : > { %v1118_v48 = vsel %vm1102_vm12, %v2386_v44, 64  ;;  %vm1148_vm0 = vcmp.lt.s32.totalorder %v1110_v16, %v1114_v14  ;;  %vm1150_vm8 = vcmp.lt.s32.totalorder %v1112_v61, %v1116_v11  ;;  %vm1140_vm7 = vcmp.lt.s32.totalorder %v1138_v3, %v1139_v59 }
 0x1de   : > { %v1120_v12 = vsel %vm1104_vm4, %v2389_v49, 64  ;;  %v1149_v36 = vsel %vm1148_vm0, %v1110_v16, %v1114_v14  ;;  %v1151_v54 = vsel %vm1150_vm8, %v1112_v61, %v1116_v11  ;;  %v1141_v6 = vsel %vm1140_vm7, %v1138_v3, %v1139_v59 }
 0x1df   : > { %vm1152_vm15 = vcmp.lt.s32.totalorder %v1149_v36, %v1118_v48  ;;  %vm1154_vm6 = vcmp.lt.s32.totalorder %v1151_v54, %v1120_v12  ;;  %v1142_v19 = vrot.slane %v1141_v6, 2  ;;  %v1122_v31 = vsel %vm1106_vm2, %v2392_v51, 64 }
 0x1e0   : > { %v1124_v2 = vsel %vm1108_vm1, %v2395_v52, 64  ;;  %v1153_v4 = vsel %vm1152_vm15, %v1149_v36, %v1118_v48  ;;  %v1155_v60 = vsel %vm1154_vm6, %v1151_v54, %v1120_v12 }
 0x1e1   : > { %vm1156_vm10 = vcmp.lt.s32.totalorder %v1153_v4, %v1122_v31  ;;  %vm1158_vm3 = vcmp.lt.s32.totalorder %v1155_v60, %v1124_v2  ;;  %vm1143_vm13 = vcmp.lt.s32.totalorder %v1141_v6, %v1142_v19 }
 0x1e2   : > { %v1157_v37 = vsel %vm1156_vm10, %v1153_v4, %v1122_v31  ;;  %v1159_v32 = vsel %vm1158_vm3, %v1155_v60, %v1124_v2  ;;  %v1144_v27 = vsel %vm1143_vm13, %v1141_v6, %v1142_v19 }
 0x1e3   : > { %vm1160_vm5 = vcmp.lt.s32.totalorder %v1157_v37, %v1159_v32  ;;  %v1145_v3 = vrot.slane %v1144_v27, 1 }
 0x1e4   : > { %v1161_v59 = vsel %vm1160_vm5, %v1157_v37, %v1159_v32 }
 0x1e5   : > { %v1162_v16 = vrot.slane %v1161_v59, 4  ;;  %vm1146_vm9 = vcmp.lt.s32.totalorder %v1144_v27, %v1145_v3 }
 0x1e6   : > { %v3278_v61 = vsel %vm1146_vm9, %v1144_v27, %v1145_v3 }
 0x1e7   : > { %vm1163_vm14 = vcmp.lt.s32.totalorder %v1161_v59, %v1162_v16  ;;  %vm1171_vm11 = vcmp.eq.s32.totalorder %v2374_v35, %v3278_v61  ;;  %vm1173_vm12 = vcmp.eq.s32.totalorder %v2377_v40, %v3278_v61  ;;  %vm1175_vm4 = vcmp.eq.s32.totalorder %v2380_v42, %v3278_v61 }
 0x1e8   : > { %v1164_v23 = vsel %vm1163_vm14, %v1161_v59, %v1162_v16  ;;  %vm1177_vm2 = vcmp.eq.s32.totalorder %v2383_v43, %v3278_v61  ;;  %vm1179_vm1 = vcmp.eq.s32.totalorder %v2386_v44, %v3278_v61  ;;  %vm1181_vm0 = vcmp.eq.s32.totalorder %v2389_v49, %v3278_v61 }
 0x1e9   : > { %v1165_v14 = vrot.slane %v1164_v23, 2  ;;  %vm1183_vm8 = vcmp.eq.s32.totalorder %v2392_v51, %v3278_v61  ;;  %vm1185_vm7 = vcmp.eq.s32.totalorder %v2395_v52, %v3278_v61  ;;  %v1882_v11 = vsel %vm1171_vm11, 1.0, %v2146_v8 }
 0x1ea   : > { %v1884_v48 = vsel %vm1173_vm12, 1.0, %v2146_v8  ;;  %v3299_v12 = vadd.f32 %v1882_v11, %v3034_v46  ;;  %v3302_v36 = vsel %vm1171_vm11, inf, %v3043_v21  ;;  %v3305_v54 = vsel %vm1173_vm12, inf, %v3049_v58 }
 0x1eb   : > { %vm1166_vm15 = vcmp.lt.s32.totalorder %v1164_v23, %v1165_v14  ;;  %v3308_v6 = vadd.f32 %v1884_v48, %v3037_v22  ;;  %v3314_v19 = vsel %vm1175_vm4, inf, %v3055_v5  ;;  %v3320_v46 = vsel %vm1177_vm2, inf, %v3061_v47 }
 0x1ec   : > { %v1167_v21 = vsel %vm1166_vm15, %v1164_v23, %v1165_v14  ;;  %v3326_v58 = vsel %vm1179_vm1, inf, %v3067_v53  ;;  %v3332_v22 = vsel %vm1181_vm0, inf, %v3073_v0  ;;  %v3338_v5 = vsel %vm1183_vm8, inf, %v3079_v7 }
 0x1ed   : > { %v1168_v47 = vrot.slane %v1167_v21, 1  ;;  %v3344_v31 = vsel %vm1185_vm7, inf, %v2996_v56  ;;  %v1254_v53 = vmin.f32 %v3302_v36, %v3314_v19  ;;  %v1255_v0 = vmin.f32 %v3305_v54, %v3320_v46 }
 0x1ee   : > { %v1886_v2 = vsel %vm1175_vm4, 1.0, %v2146_v8  ;;  %v1888_v7 = vsel %vm1177_vm2, 1.0, %v2146_v8  ;;  %v1890_v56 = vsel %vm1179_vm1, 1.0, %v2146_v8  ;;  %v1892_v4 = vsel %vm1181_vm0, 1.0, %v2146_v8 }
 0x1ef   : > { %vm1169_vm6 = vcmp.lt.s32.totalorder %v1167_v21, %v1168_v47  ;;  %v1256_v60 = vmin.f32 %v1254_v53, %v3326_v58  ;;  %v1257_v37 = vmin.f32 %v1255_v0, %v3332_v22  ;;  %v3369_v32 = vadd.f32 %v1886_v2, %v3100_v38 }
 0x1f0   : > { %v1170_v27 = vsel %vm1169_vm6, %v1167_v21, %v1168_v47  ;;  %v3372_v3 = vadd.f32 %v1888_v7, %v3103_v45  ;;  %v3375_v59 = vadd.f32 %v1890_v56, %v3110_v50  ;;  %v3378_v16 = vadd.f32 %v1892_v4, %v3119_v9 }
 0x1f1   : > { %vm1172_vm10 = vcmp.eq.s32.totalorder %v2374_v35, %v1170_v27  ;;  %vm1174_vm3 = vcmp.eq.s32.totalorder %v2377_v40, %v1170_v27  ;;  %vm1176_vm13 = vcmp.eq.s32.totalorder %v2380_v42, %v1170_v27  ;;  %vm1178_vm5 = vcmp.eq.s32.totalorder %v2383_v43, %v1170_v27 }
 0x1f2   : > { %vm1180_vm9 = vcmp.eq.s32.totalorder %v2386_v44, %v1170_v27  ;;  %vm1182_vm14 = vcmp.eq.s32.totalorder %v2389_v49, %v1170_v27  ;;  %vm1184_vm11 = vcmp.eq.s32.totalorder %v2392_v51, %v1170_v27  ;;  %vm1186_vm12 = vcmp.eq.s32.totalorder %v2395_v52, %v1170_v27 }
 0x1f3   : > { %vm1251_vm4 = vcmp.eq.s32.totalorder %v2374_v35, 3  ;;  %v1883_v38 = vsel %vm1172_vm10, 1.0, %v2146_v8  ;;  %v1885_v45 = vsel %vm1174_vm3, 1.0, %v2146_v8  ;;  %v3392_v50 = vsel %vm1172_vm10, inf, %v3153_v26 }
 0x1f4   : > { %v3395_v9 = vsel %vm1174_vm3, inf, %v3162_v29  ;;  %v3398_v23 = vadd.f32 %v1883_v38, %v3156_v34  ;;  %v3401_v14 = vadd.f32 %v1885_v45, %v3159_v62  ;;  %v3406_v11 = vsel %vm1176_vm13, inf, %v3167_v41 }
 0x1f5   : > { %v3411_v48 = vsel %vm1178_vm5, inf, %v3172_v15  ;;  %v3416_v26 = vsel %vm1180_vm9, inf, %v3177_v18  ;;  %v3421_v34 = vsel %vm1182_vm14, inf, %v3182_v10  ;;  %v3426_v62 = vsel %vm1184_vm11, inf, %v3187_v20 }
 0x1f6   : > { %v3431_v29 = vsel %vm1186_vm12, inf, %v3144_v63  ;;  %v1267_v41 = vmin.f32 %v3392_v50, %v3406_v11  ;;  %v1268_v15 = vmin.f32 %v3395_v9, %v3411_v48  ;;  %v1258_v18 = vmin.f32 %v1256_v60, %v3338_v5 }
 0x1f7   : > { %v1259_v10 = vmin.f32 %v1257_v37, %v3344_v31  ;;  %v1887_v20 = vsel %vm1176_vm13, 1.0, %v2146_v8  ;;  %v1889_v21 = vsel %vm1178_vm5, 1.0, %v2146_v8  ;;  %v1891_v63 = vsel %vm1180_vm9, 1.0, %v2146_v8 }
 0x1f8   : > { %v1893_v47 = vsel %vm1182_vm14, 1.0, %v2146_v8  ;;  %v1269_v53 = vmin.f32 %v1267_v41, %v3416_v26  ;;  %v1270_v0 = vmin.f32 %v1268_v15, %v3421_v34  ;;  %v3454_v7 = vadd.f32 %v1887_v20, %v3200_v24 }
 0x1f9   : > { %v1260_v2 = vmin.f32 %v1258_v18, %v1259_v10  ;;  %v3457_v56 = vadd.f32 %v1889_v21, %v3211_v55  ;;  %v3460_v4 = vadd.f32 %v1891_v63, %v3214_v57  ;;  %v3463_v60 = vadd.f32 %v1893_v47, %v3217_v28 }
 0x1fa   : > { %v1895_v37 = vsel %vm1184_vm11, 1.0, %v2146_v8  ;;  %v1271_v38 = vmin.f32 %v1269_v53, %v3426_v62  ;;  %v1272_v45 = vmin.f32 %v1270_v0, %v3431_v29  ;;  %v1897_v24 = vsel %vm1186_vm12, 1.0, %v2146_v8 }
 0x1fb   : > { %v1261_v41 = vrot.slane %v1260_v2, 4  ;;  %v3474_v55 = vadd.f32 %v1895_v37, %v3228_v33  ;;  %v3477_v57 = vadd.f32 %v1897_v24, %v3231_v25  ;;  %v1894_v28 = vsel %vm1183_vm8, 1.0, %v2146_v8 }
 0x1fc   : > { %v1896_v15 = vsel %vm1185_vm7, 1.0, %v2146_v8  ;;  %v1273_v18 = vmin.f32 %v1271_v38, %v1272_v45  ;;  %v3488_v20 = vadd.f32 %v1894_v28, %v3126_v13  ;;  %v3497_v25 = vsel %vm1251_vm4, %v3278_v61, %v3135_v17 }
 0x1fd   : > { %v1262_v10 = vmin.f32 %v1260_v2, %v1261_v41  ;;  %v3491_v33 = vadd.f32 %v1896_v15, %v3129_v1  ;;  %v3502_v21 = vsel %vm1251_vm4, %v1170_v27, %v3236_v39 }
 0x1fe   : > { %v1274_v63 = vrot.slane %v1273_v18, 4 }
 0x1ff   : > { %v1263_v47 = vrot.slane %v1262_v10, 2 }
 0x200   : > { %v1275_v53 = vmin.f32 %v1273_v18, %v1274_v63 }
 0x201   : > { %v1264_v0 = vmin.f32 %v1262_v10, %v1263_v47 }
 0x202   : > { %v1276_v13 = vrot.slane %v1275_v53, 2 }
 0x203   : > { %v1265_v2 = vrot.slane %v1264_v0, 1 }
 0x204   : > { %v1277_v37 = vmin.f32 %v1275_v53, %v1276_v13 }
 0x205   : > { %v1266_v1 = vmin.f32 %v1264_v0, %v1265_v2 }
 0x206   : > { %v1278_v38 = vrot.slane %v1277_v37, 1 }
 0x207   : > { %vm1280_vm2 = vcmp.eq.f32.partialorder %v3302_v36, %v1266_v1  ;;  %vm1282_vm1 = vcmp.eq.f32.partialorder %v3305_v54, %v1266_v1  ;;  %vm1284_vm0 = vcmp.eq.f32.partialorder %v3314_v19, %v1266_v1  ;;  %vm1286_vm8 = vcmp.eq.f32.partialorder %v3320_v46, %v1266_v1 }
 0x208   : > { %vm1288_vm7 = vcmp.eq.f32.partialorder %v3326_v58, %v1266_v1  ;;  %vm1290_vm15 = vcmp.eq.f32.partialorder %v3332_v22, %v1266_v1  ;;  %vm1292_vm6 = vcmp.eq.f32.partialorder %v3338_v5, %v1266_v1  ;;  %v1279_v17 = vmin.f32 %v1277_v37, %v1278_v38 }
 0x209   : > { %vm1294_vm10 = vcmp.eq.f32.partialorder %v3344_v31, %v1266_v1  ;;  %v1296_v39 = vsel %vm1280_vm2, %v2374_v35, 64  ;;  %v1298_v61 = vsel %vm1282_vm1, %v2377_v40, 64  ;;  %v1300_v36 = vsel %vm1284_vm0, %v2380_v42, 64 }
 0x20a   : > { %v1302_v54 = vsel %vm1286_vm8, %v2383_v43, 64  ;;  %v1304_v19 = vsel %vm1288_vm7, %v2386_v44, 64  ;;  %v1306_v46 = vsel %vm1290_vm15, %v2389_v49, 64  ;;  %vm1281_vm3 = vcmp.eq.f32.partialorder %v3392_v50, %v1279_v17 }
 0x20b   : > { %vm1283_vm13 = vcmp.eq.f32.partialorder %v3395_v9, %v1279_v17  ;;  %vm1285_vm5 = vcmp.eq.f32.partialorder %v3406_v11, %v1279_v17  ;;  %vm1287_vm9 = vcmp.eq.f32.partialorder %v3411_v48, %v1279_v17  ;;  %vm1289_vm14 = vcmp.eq.f32.partialorder %v3416_v26, %v1279_v17 }
 0x20c   : > { %vm1291_vm11 = vcmp.eq.f32.partialorder %v3421_v34, %v1279_v17  ;;  %vm1293_vm12 = vcmp.eq.f32.partialorder %v3426_v62, %v1279_v17  ;;  %vm1295_vm4 = vcmp.eq.f32.partialorder %v3431_v29, %v1279_v17  ;;  %v1297_v58 = vsel %vm1281_vm3, %v2374_v35, 64 }
 0x20d   : > { %v1299_v22 = vsel %vm1283_vm13, %v2377_v40, 64  ;;  %v1301_v27 = vsel %vm1285_vm5, %v2380_v42, 64  ;;  %v1303_v50 = vsel %vm1287_vm9, %v2383_v43, 64  ;;  %v1305_v9 = vsel %vm1289_vm14, %v2386_v44, 64 }
 0x20e   : > { %v1307_v11 = vsel %vm1291_vm11, %v2389_v49, 64  ;;  %v1309_v48 = vsel %vm1293_vm12, %v2392_v51, 64  ;;  %v1311_v26 = vsel %vm1295_vm4, %v2395_v52, 64  ;;  %vm1335_vm2 = vcmp.lt.s32.totalorder %v1297_v58, %v1301_v27 }
 0x20f   : > { %vm1337_vm1 = vcmp.lt.s32.totalorder %v1299_v22, %v1303_v50  ;;  %v1308_v34 = vsel %vm1292_vm6, %v2392_v51, 64  ;;  %v1310_v62 = vsel %vm1294_vm10, %v2395_v52, 64  ;;  %v1336_v29 = vsel %vm1335_vm2, %v1297_v58, %v1301_v27 }
 0x210   : > { %v1338_v45 = vsel %vm1337_vm1, %v1299_v22, %v1303_v50  ;;  %vm1312_vm0 = vcmp.lt.s32.totalorder %v1296_v39, %v1300_v36  ;;  %vm1314_vm8 = vcmp.lt.s32.totalorder %v1298_v61, %v1302_v54  ;;  %vm1339_vm7 = vcmp.lt.s32.totalorder %v1336_v29, %v1305_v9 }
 0x211   : > { %vm1341_vm15 = vcmp.lt.s32.totalorder %v1338_v45, %v1307_v11  ;;  %v1313_v41 = vsel %vm1312_vm0, %v1296_v39, %v1300_v36  ;;  %v1315_v24 = vsel %vm1314_vm8, %v1298_v61, %v1302_v54  ;;  %v1340_v28 = vsel %vm1339_vm7, %v1336_v29, %v1305_v9 }
 0x212   : > { %v1342_v15 = vsel %vm1341_vm15, %v1338_v45, %v1307_v11  ;;  %vm1316_vm3 = vcmp.lt.s32.totalorder %v1313_v41, %v1304_v19  ;;  %vm1318_vm13 = vcmp.lt.s32.totalorder %v1315_v24, %v1306_v46  ;;  %vm1343_vm5 = vcmp.lt.s32.totalorder %v1340_v28, %v1309_v48 }
 0x213   : > { %vm1345_vm9 = vcmp.lt.s32.totalorder %v1342_v15, %v1311_v26  ;;  %v1317_v5 = vsel %vm1316_vm3, %v1313_v41, %v1304_v19  ;;  %v1319_v18 = vsel %vm1318_vm13, %v1315_v24, %v1306_v46  ;;  %v1344_v10 = vsel %vm1343_vm5, %v1340_v28, %v1309_v48 }
 0x214   : > { %v1346_v63 = vsel %vm1345_vm9, %v1342_v15, %v1311_v26  ;;  %vm1320_vm6 = vcmp.lt.s32.totalorder %v1317_v5, %v1308_v34  ;;  %vm1322_vm10 = vcmp.lt.s32.totalorder %v1319_v18, %v1310_v62  ;;  %vm1422_vm9 = vcmp.eq.s32.totalorder %v2374_v35, 4 }
 0x215   : > { %vm1347_vm14 = vcmp.lt.s32.totalorder %v1344_v10, %v1346_v63  ;;  %v1321_v31 = vsel %vm1320_vm6, %v1317_v5, %v1308_v34  ;;  %v1323_v47 = vsel %vm1322_vm10, %v1319_v18, %v1310_v62 }
 0x216   : > { %v1348_v53 = vsel %vm1347_vm14, %v1344_v10, %v1346_v63  ;;  %vm1324_vm11 = vcmp.lt.s32.totalorder %v1321_v31, %v1323_v47 }
 0x217   : > { %v1349_v0 = vrot.slane %v1348_v53, 4  ;;  %v1325_v13 = vsel %vm1324_vm11, %v1321_v31, %v1323_v47  ;;  %v1441_v31 = vpop.trf.xlu0 }
 0x218   : > { %v1326_v2 = vrot.slane %v1325_v13, 4 }
 0x219   : > { %vm1350_vm12 = vcmp.lt.s32.totalorder %v1348_v53, %v1349_v0 }
 0x21a   : > { %v1351_v37 = vsel %vm1350_vm12, %v1348_v53, %v1349_v0  ;;  %vm1327_vm4 = vcmp.lt.s32.totalorder %v1325_v13, %v1326_v2 }
 0x21b   : > { %v1352_v1 = vrot.slane %v1351_v37, 2  ;;  %v1328_v38 = vsel %vm1327_vm4, %v1325_v13, %v1326_v2 }
 0x21c   : > { %v1329_v17 = vrot.slane %v1328_v38, 2 }
 0x21d   : > { %vm1353_vm2 = vcmp.lt.s32.totalorder %v1351_v37, %v1352_v1 }
 0x21e   : > { %v1354_v39 = vsel %vm1353_vm2, %v1351_v37, %v1352_v1  ;;  %vm1330_vm1 = vcmp.lt.s32.totalorder %v1328_v38, %v1329_v17 }
 0x21f   : > { %v1355_v61 = vrot.slane %v1354_v39, 1  ;;  %v1331_v36 = vsel %vm1330_vm1, %v1328_v38, %v1329_v17 }
 0x220   : > { %v1332_v54 = vrot.slane %v1331_v36, 1 }
 0x221   : > { %vm1356_vm0 = vcmp.lt.s32.totalorder %v1354_v39, %v1355_v61 }
 0x222   : > { %v3540_v19 = vsel %vm1356_vm0, %v1354_v39, %v1355_v61  ;;  %vm1333_vm8 = vcmp.lt.s32.totalorder %v1331_v36, %v1332_v54 }
 0x223   : > { %vm1359_vm7 = vcmp.eq.s32.totalorder %v2374_v35, %v3540_v19  ;;  %vm1361_vm15 = vcmp.eq.s32.totalorder %v2377_v40, %v3540_v19  ;;  %v1334_v46 = vsel %vm1333_vm8, %v1331_v36, %v1332_v54  ;;  %vm1363_vm3 = vcmp.eq.s32.totalorder %v2380_v42, %v3540_v19 }
 0x224   : > { %v1899_v58 = vsel %vm1359_vm7, 1.0, %v2146_v8  ;;  %v1901_v22 = vsel %vm1361_vm15, 1.0, %v2146_v8  ;;  %vm1358_vm13 = vcmp.eq.s32.totalorder %v2374_v35, %v1334_v46  ;;  %vm1360_vm5 = vcmp.eq.s32.totalorder %v2377_v40, %v1334_v46 }
 0x225   : > { %v1407_v27 = vadd.f32 %v1899_v58, %v3398_v23  ;;  %v1409_v50 = vadd.f32 %v1901_v22, %v3401_v14  ;;  %v1898_v9 = vsel %vm1358_vm13, 1.0, %v2146_v8  ;;  %v1900_v11 = vsel %vm1360_vm5, 1.0, %v2146_v8 }
 0x226   : > { %v1406_v48 = vadd.f32 %v1898_v9, %v3299_v12  ;;  %v1408_v26 = vadd.f32 %v1900_v11, %v3308_v6  ;;  %vm1365_vm6 = vcmp.eq.s32.totalorder %v2383_v43, %v3540_v19  ;;  %v1903_v34 = vsel %vm1363_vm3, 1.0, %v2146_v8 }
 0x227   : > { %v1941_v40 = vpack.c.bf16 %v1409_v50, %v1407_v27  ;;  %v1905_v23 = vsel %vm1365_vm6, 1.0, %v2146_v8  ;;  %v1411_v14 = vadd.f32 %v1903_v34, %v3454_v7  ;;  %vm1362_vm10 = vcmp.eq.s32.totalorder %v2380_v42, %v1334_v46 }
 0x228   : > { %v1943_v62 = vpack.c.bf16 %v1408_v26, %v1406_v48  ;;  %v1413_v29 = vadd.f32 %v1905_v23, %v3457_v56  ;;  %vm1364_vm14 = vcmp.eq.s32.totalorder %v2383_v43, %v1334_v46  ;;  %v1902_v12 = vsel %vm1362_vm10, 1.0, %v2146_v8 }
 0x229   : > { %1942 = vmatprep.subr.bf16.mxu1 %v1941_v40  ;;  %v1904_v6 = vsel %vm1364_vm14, 1.0, %v2146_v8  ;;  %v1410_v45 = vadd.f32 %v1902_v12, %v3369_v32  ;;  %vm1367_vm11 = vcmp.eq.s32.totalorder %v2386_v44, %v3540_v19  ;;  %vm1369_vm12 = vcmp.eq.s32.totalorder %v2389_v49, %v3540_v19 }
 0x22a   : > { %1944 = vmatpush1.bf16.msra.mxu1 %v1943_v62  ;;  %v1945_v42 = vpack.c.bf16 %v1413_v29, %v1411_v14  ;;  %v1412_v7 = vadd.f32 %v1904_v6, %v3372_v3  ;;  %v1907_v43 = vsel %vm1367_vm11, 1.0, %v2146_v8  ;;  %v1909_v56 = vsel %vm1369_vm12, 1.0, %v2146_v8 }
 0x22b   : > { %v1415_v41 = vadd.f32 %v1907_v43, %v3460_v4  ;;  %v1417_v24 = vadd.f32 %v1909_v56, %v3463_v60  ;;  %vm1366_vm4 = vcmp.eq.s32.totalorder %v2386_v44, %v1334_v46  ;;  %vm1368_vm2 = vcmp.eq.s32.totalorder %v2389_v49, %v1334_v46 }
 0x22c   : > { %1946 = vmatprep.subr.bf16.mxu1 %v1945_v42  ;;  %v1947_v32 = vpack.c.bf16 %v1412_v7, %v1410_v45  ;;  %v1906_v28 = vsel %vm1366_vm4, 1.0, %v2146_v8  ;;  %v1908_v15 = vsel %vm1368_vm2, 1.0, %v2146_v8  ;;  %vm1371_vm1 = vcmp.eq.s32.totalorder %v2392_v51, %v3540_v19 }
 0x22d   : > { %v1949_v3 = vpack.c.bf16 %v1417_v24, %v1415_v41  ;;  %v1414_v5 = vadd.f32 %v1906_v28, %v3375_v59  ;;  %v1416_v4 = vadd.f32 %v1908_v15, %v3378_v16  ;;  %vm1373_vm0 = vcmp.eq.s32.totalorder %v2395_v52, %v3540_v19 }
 0x22e   : > { %1948 = vmatpush1.bf16.msra.mxu1 %v1947_v32  ;;  %v1911_v44 = vsel %vm1371_vm1, 1.0, %v2146_v8  ;;  %v1913_v49 = vsel %vm1373_vm0, 1.0, %v2146_v8  ;;  %vm1370_vm8 = vcmp.eq.s32.totalorder %v2392_v51, %v1334_v46  ;;  %vm1372_vm7 = vcmp.eq.s32.totalorder %v2395_v52, %v1334_v46 }
 0x22f   : > { %1950 = vmatprep.subr.bf16.mxu1 %v1949_v3  ;;  %v1951_v60 = vpack.c.bf16 %v1416_v4, %v1414_v5  ;;  %v1419_v18 = vadd.f32 %v1911_v44, %v3474_v55  ;;  %v1421_v59 = vadd.f32 %v1913_v49, %v3477_v57  ;;  %v1910_v16 = vsel %vm1370_vm8, 1.0, %v2146_v8 }
 0x230   : > { %v1912_v10 = vsel %vm1372_vm7, 1.0, %v2146_v8  ;;  %v1418_v63 = vadd.f32 %v1910_v16, %v3488_v20  ;;  %v1423_v47 = vsel %vm1422_vm9, %v1334_v46, %v3497_v25  ;;  %v1424_v51 = vsel %vm1422_vm9, %v3540_v19, %v3502_v21  ;;  %v1442_v20 = vpop.trf.xlu0 }
 0x231   : > { %v1953_v52 = vpack.c.bf16 %v1421_v59, %v1419_v18  ;;  %v1420_v55 = vadd.f32 %v1912_v10, %v3491_v33  ;;  %1575 = vst [vmem:[%s267_s9] sm:$0xff] %v1423_v47  ;;  %1576 = vst [vmem:[%s267_s9 + $0x8] sm:$0xff] %v1424_v51  ;;  %vm1457_vm15 = vcmask 523264  }
 0x232   : > { %1952 = vmatpush1.bf16.msra.mxu1 %v1951_v60 }
 0x233   : > { %1954 = vmatprep.subr.bf16.mxu1 %v1953_v52  ;;  %v1955_v57 = vpack.c.bf16 %v1420_v55, %v1418_v63 }
 0x234   : > { %v1443_v25 = vpop.trf.xlu0 }
 0x236   : > { %1956 = vmatpush1.bf16.msra.mxu1 %v1955_v57 }
 0x238   : > { %v1444_v33 = vpop.trf.xlu0 }
 0x239   : > { %1914 = vmatmul.mubr.msk.f32.vlgmr.msra.gmra.mrb[0].mxu1 %vm1457_vm15, %v1441_v31 }
 0x23a   : > { %1540 = vmatprep.mubr.f32.mxu1 %v2146_v8 }
 0x23d   : > { %1915 = vmatmul.mubr.msk.f32.gmra.mrb[2].mxu1 %vm1457_vm15, %v1442_v20 }
 0x23e   : > { %1546 = vmatprep.mubr.f32.mxu1 %v2146_v8 }
 0x241   : > { %1916 = vmatmul.mubr.msk.f32.gmra.mrb[4].mxu1 %vm1457_vm15, %v1443_v25 }
 0x242   : > { %1552 = vmatprep.mubr.f32.mxu1 %v2146_v8 }
 0x245   : > { %1917 = vmatmul.mubr.msk.f32.gmra.mrb[6].mxu1 %vm1457_vm15, %v1444_v33 }
 0x246   : > { %2035 = shalt.err (!%p2032_p5)
}
 0x247   : > { %s2036_s9 = scalar_lea.hbm %s3617_s17, 256  ;;  %s2040_s15 = scalar_lea.hbm %s3744_s4, 512 }
 0x248   : > { %p2037_p7 = scmp.ne.s32.totalorder %s3617_s17, %s2036_s9  ;;  %p2041_p12 = scmp.lt.u32.totalorder %s3617_s17, %s3744_s4 }
 0x249   : > { %p2042_p13 = scmp.lt.u32.totalorder %s2040_s15, %s2036_s9  ;;  %p2044_p1 = scmp.lt.u32.totalorder %s2036_s9, %s3617_s17 }
 0x24a   : > { %p2038_p10 = pnand %p2037_p7, %p2224_p6 }
 0x24b   : > { %p2043_p0 = por %p2042_p13, %p2041_p12 }
 0x24c   : > { %p2039_p11 = pneg %p2038_p10 }
 0x24d   : > { %p2045_p2 = por %p2044_p1, %p2043_p0 }
 0x24f   : > { %p2046_p3 = pnand %p2045_p2, %p2039_p11 }
 0x251   : > { %2049 = shalt.err (!%p2046_p3)
}
 0x252   : > { %1958 = dma.vmem_to_hbm [thread:$0]  (%p2224_p6), %s1676_s25, 256, %s3617_s17, %s3619_s26   ;;  %v2014_v2 = vld [vmem:[%s2255_s16] sm:$0xff]  ;;  %v2015_v17 = vld [vmem:[%s2255_s16 + $0x8] sm:$0xff]  ;;  %v2016_v36 = vld [vmem:[%s2255_s16 + $0x10] sm:$0xff] }
 0x253   : > { %s3641_s30 = scalar_lea.vmem [#allocation3], %s1822_s13  ;;  %v2017_v19 = vld [vmem:[%s2255_s16 + $0x18] sm:$0xff]  ;;  %v2018_v40 = vld [vmem:[%s2255_s16 + $0x20] sm:$0xff]  ;;  %v2019_v62 = vld [vmem:[%s2255_s16 + $0x28] sm:$0xff]  ;;  %s3663_s8 = scalar_lea.hbm %s3743_s3, %s1930_s11 }
 0x254   : > { %s1658_s13 = sshll.u32 %s3641_s30, 4  ;;  %v2020_v41 = vld [vmem:[%s2255_s16 + $0x30] sm:$0xff]  ;;  %v2021_v28 = vld [vmem:[%s2255_s16 + $0x38] sm:$0xff]  ;;  %s1635_s9 = scalar_lea.sflag [#allocation4], %s2245_s12  ;;  %s3654_s13 = int_to_ptr.vmem [resolvable:$true] %s1658_s13 }
 0x255   : > { %s2050_s10 = scalar_lea.vmem %s3654_s13, 1024  ;;  %s2149_s11 = smov [#allocation3]  }
 0x256   : > { %p2051_p4 = scmp.ne.s32.totalorder %s3654_s13, %s2050_s10  ;;  %s2054_s14 = sshll.u32 %s2149_s11, 4  ;;  %s2055_s14 = int_to_ptr.vmem [resolvable:$false] %s2054_s14 }
 0x257   : > { %s2056_s15 = scalar_lea.vmem %s2055_s14, 2048  ;;  %p2057_p10 = scmp.lt.s32.totalorder %s3654_s13, %s2055_s14 }
 0x258   : > { %p2052_p5 = pnand %p2051_p4, %p2224_p6  ;;  %p2058_p11 = scmp.lt.s32.totalorder %s2056_s15, %s2050_s10 }
 0x25a   : > { %p2053_p7 = pneg %p2052_p5  ;;  %p2059_p12 = por %p2058_p11, %p2057_p10 }
 0x25c   : > { %p2060_p13 = pnand %p2059_p12, %p2053_p7 }
 0x30c   : > { %v1536_v8 = vpop.f32.mrb[0].mxu1 }
 0x30d   : > { %v1559_v21 = vmul.f32 0.2, %v1536_v8  ;;  %v1538_v53 = vpop.f32.mrb[1].mxu1 }
 0x30e   : > { %v1560_v0 = vmul.f32 0.2, %v1538_v53 }
 0x30f   : > { %1567 = vst [vmem:[%s3641_s30] sm:$0xff] %v1559_v21  ;;  %v1577_v37 = vsub.f32 %v1559_v21, %v2014_v2 }
 0x310   : > { %1568 = vst [vmem:[%s3641_s30 + $0x8] sm:$0xff] %v1560_v0  ;;  %v1542_v13 = vpop.f32.mrb[2].mxu1  ;;  %v1578_v39 = vsub.f32 %v1560_v0, %v2015_v17 }
 0x311   : > { %v1561_v1 = vmul.f32 0.2, %v1542_v13  ;;  %v1544_v38 = vpop.f32.mrb[3].mxu1  ;;  %v1585_v22 = vmul.f32 %v1577_v37, %v1577_v37 }
 0x312   : > { %v1562_v61 = vmul.f32 0.2, %v1544_v38  ;;  %v1586_v11 = vmul.f32 %v1578_v39, %v1578_v39 }
 0x313   : > { %1569 = vst [vmem:[%s3641_s30 + $0x10] sm:$0xff] %v1561_v1  ;;  %v1579_v54 = vsub.f32 %v1561_v1, %v2016_v36 }
 0x314   : > { %1570 = vst [vmem:[%s3641_s30 + $0x18] sm:$0xff] %v1562_v61  ;;  %v1580_v46 = vsub.f32 %v1562_v61, %v2017_v19  ;;  %v1548_v58 = vpop.f32.mrb[4].mxu1 }
 0x315   : > { %v1587_v27 = vmul.f32 %v1579_v54, %v1579_v54  ;;  %v1563_v50 = vmul.f32 0.2, %v1548_v58  ;;  %v1550_v9 = vpop.f32.mrb[5].mxu1 }
 0x316   : > { %v1588_v48 = vmul.f32 %v1580_v46, %v1580_v46  ;;  %v1564_v26 = vmul.f32 0.2, %v1550_v9 }
 0x317   : > { %v1593_v34 = vadd.f32 %v1587_v27, %v1585_v22  ;;  %1571 = vst [vmem:[%s3641_s30 + $0x20] sm:$0xff] %v1563_v50  ;;  %v1581_v23 = vsub.f32 %v1563_v50, %v2018_v40 }
 0x318   : > { %v1602_v14 = vadd.f32 %v1588_v48, %v1586_v11  ;;  %1572 = vst [vmem:[%s3641_s30 + $0x28] sm:$0xff] %v1564_v26  ;;  %v1582_v29 = vsub.f32 %v1564_v26, %v2019_v62  ;;  %v1554_v12 = vpop.f32.mrb[6].mxu1 }
 0x319   : > { %v1589_v6 = vmul.f32 %v1581_v23, %v1581_v23  ;;  %v1565_v45 = vmul.f32 0.2, %v1554_v12  ;;  %v1556_v42 = vpop.f32.mrb[7].mxu1 }
 0x31a   : > { %v1590_v7 = vmul.f32 %v1582_v29, %v1582_v29  ;;  %v1566_v43 = vmul.f32 0.2, %v1556_v42 }
 0x31b   : > { %v1594_v56 = vadd.f32 %v1593_v34, %v1589_v6  ;;  %1573 = vst [vmem:[%s3641_s30 + $0x30] sm:$0xff] %v1565_v45  ;;  %v1583_v24 = vsub.f32 %v1565_v45, %v2020_v41 }
 0x31c   : > { %v1603_v32 = vadd.f32 %v1602_v14, %v1590_v7  ;;  %1574 = vst [vmem:[%s3641_s30 + $0x38] sm:$0xff] %v1566_v43  ;;  %v1584_v15 = vsub.f32 %v1566_v43, %v2021_v28 }
 0x31d   : > { %v1591_v3 = vmul.f32 %v1583_v24, %v1583_v24 }
 0x31e   : > { %2063 = shalt.err (!%p2060_p13)
}
 0x31f   : > { %s2064_s16 = scalar_lea.hbm %s3663_s8, 1024  ;;  %s2068_s30 = scalar_lea.hbm %s3743_s3, 2048 }
 0x320   : > { %p2065_p0 = scmp.ne.s32.totalorder %s3663_s8, %s2064_s16  ;;  %p2069_p3 = scmp.lt.u32.totalorder %s3663_s8, %s3743_s3 }
 0x321   : > { %p2070_p4 = scmp.lt.u32.totalorder %s2068_s30, %s2064_s16  ;;  %p2072_p7 = scmp.lt.u32.totalorder %s2064_s16, %s3663_s8 }
 0x322   : > { %p2066_p1 = pnand %p2065_p0, %p2224_p6 }
 0x323   : > { %p2071_p5 = por %p2070_p4, %p2069_p3 }
 0x324   : > { %p2067_p2 = pneg %p2066_p1 }
 0x325   : > { %p2073_p10 = por %p2072_p7, %p2071_p5 }
 0x327   : > { %p2074_p11 = pnand %p2073_p10, %p2067_p2 }
 0x329   : > { %2077 = shalt.err (!%p2074_p11)
}
 0x32a   : > { %s2150_s10 = smov 256   ;;  %s2151_s11 = smov 512   ;;  %v1592_v5 = vmul.f32 %v1584_v15, %v1584_v15  ;;  %v1595_v4 = vadd.f32 %v1594_v56, %v1591_v3  ;;  %v2153_v16 = vmov 1966171168   ;;  %vm1631_vm3 = vcmp.lt.s32.totalorder %v497_v30, 256 }
 0x32b   : > { %s2152_s14 = smov 16   ;;  %v1615_v10 = vunpack.c.l.s4 %v2153_v16  ;;  %s1825_s15 = sshll.u32 %s2245_s12, 1 }
 0x32c   : > { %1957 = dma.vmem_to_hbm [thread:$0]  (%p2224_p6), %s3654_s13, 1024, %s3663_s8, %s1635_s9, %s2150_s10, %s2151_s11, %s2152_s14   ;;  %v1604_v44 = vadd.f32 %v1603_v32, %v1592_v5  ;;  %v1596_v49 = vrot.slane %v1595_v4, 4 }
 0x32d   : > { %v1616_v52 = vunpack.c.0.s8 %v1615_v10  ;;  %s1932_s13 = sshll.u32 %s2206_s22, 5  ;;  %s274_s8 = scalar_lea.vmem [#allocation7], %s1825_s15 }
 0x32e   : > { %v1605_v60 = vrot.slane %v1604_v44, 4  ;;  %v1597_v18 = vadd.f32 %v1596_v49, %v1595_v4  ;;  %s1689_s9 = sshll.u32 %s274_s8, 4  ;;  %s3700_s7 = scalar_lea.hbm %s3745_s5, %s1932_s13  ;;  %s1690_s9 = int_to_ptr.vmem [resolvable:$true] %s1689_s9 }
 0x32f   : > { %v1619_v33 = vsub.s32 %v1616_v52, %v2374_v35  ;;  %s2078_s12 = scalar_lea.vmem %s1690_s9, 32  ;;  %s2154_s30 = smov [#allocation7]  }
 0x330   : > { %v1606_v59 = vadd.f32 %v1605_v60, %v1604_v44  ;;  %v1598_v63 = vrot.slane %v1597_v18, 2  ;;  %p2079_p12 = scmp.ne.s32.totalorder %s1690_s9, %s2078_s12  ;;  %s2082_s22 = sshll.u32 %s2154_s30, 4  ;;  %s2083_s22 = int_to_ptr.vmem [resolvable:$false] %s2082_s22 }
 0x331   : > { %s2084_s17 = scalar_lea.vmem %s2083_s22, 64  ;;  %p2085_p1 = scmp.lt.s32.totalorder %s1690_s9, %s2083_s22 }
 0x332   : > { %v1607_v31 = vrot.slane %v1606_v59, 2  ;;  %v1599_v47 = vadd.f32 %v1598_v63, %v1597_v18  ;;  %p2080_p13 = pnand %p2079_p12, %p2224_p6  ;;  %p2086_p2 = scmp.lt.s32.totalorder %s2084_s17, %s2078_s12 }
 0x334   : > { %v1608_v51 = vadd.f32 %v1607_v31, %v1606_v59  ;;  %v1600_v55 = vrot.slane %v1599_v47, 1  ;;  %p2081_p0 = pneg %p2080_p13  ;;  %p2087_p3 = por %p2086_p2, %p2085_p1 }
 0x336   : > { %v1609_v57 = vrot.slane %v1608_v51, 1  ;;  %v1601_v20 = vadd.f32 %v1600_v55, %v1599_v47  ;;  %p2088_p4 = pnand %p2087_p3, %p2081_p0 }
 0x338   : > { %v1610_v25 = vadd.f32 %v1609_v57, %v1608_v51 }
 0x33a   : > { %v1613_v8 = vcombine.low %v1601_v20, %v1610_v25 }
 0x33c   : > { %v1620_v21 = vrot.slane %v1613_v8, %v1619_v33 }
 0x33e   : > { %v1627_v53 = vrot.slane %v1620_v21, %v1619_v33 }
 0x340   : > { %1633 = vst.msk [vmem:[%s274_s8] sm:$0x3] %vm1631_vm3, %v1627_v53 }
 0x341   : > { %2091 = shalt.err (!%p2088_p4)
}
 0x342   : > { %s2092_s25 = scalar_lea.hbm %s3700_s7, 32  ;;  %s2096_s14 = scalar_lea.hbm %s3745_s5, 64 }
 0x343   : > { %p2093_p5 = scmp.ne.s32.totalorder %s3700_s7, %s2092_s25  ;;  %p2097_p11 = scmp.lt.u32.totalorder %s3700_s7, %s3745_s5 }
 0x344   : > { %p2098_p12 = scmp.lt.u32.totalorder %s2096_s14, %s2092_s25  ;;  %p2100_p0 = scmp.lt.u32.totalorder %s2092_s25, %s3700_s7 }
 0x345   : > { %p2094_p7 = pnand %p2093_p5, %p2224_p6 }
 0x346   : > { %p2099_p13 = por %p2098_p12, %p2097_p11 }
 0x347   : > { %p2095_p10 = pneg %p2094_p7 }
 0x348   : > { %p2101_p1 = por %p2100_p0, %p2099_p13 }
 0x34a   : > { %p2102_p2 = pnand %p2101_p1, %p2095_p10 }
 0x34c   : > { %2105 = shalt.err (!%p2102_p2)
}
 0x34d   : > { %1959 = dma.vmem_to_hbm [thread:$0]  (%p2224_p6), %s1690_s9, 32, %s3700_s7, %s3619_s26  }
 0x34e PF: > { %s1701_s8 = sand.u32 1, %s2132_s18   ;;  %p1964_p3 = pnand %p1817_p9, %p2230_p8 }
 0x34f   : > { %s1702_s16 = scalar_lea.sflag [#allocation4], %s1701_s8 }
 0x350   : > { %2123 = dma.done.wait (!%p1964_p3), %s1702_s16, 1024  }
 0x351   : > { %2125 = vsyncadd (!%p1964_p3), %s1702_s16, 4294966272  ;;  %s1710_s6 = sand.u32 1, %s1815_s23  }
 0x352   : > { %s1711_s12 = scalar_lea.sflag [#allocation6], %s1710_s6 }
 0x353   : > { %2127 = dma.done.wait (!%p1964_p3), %s1711_s12, 288  }
 0x354   : > { %2129 = vsyncadd (!%p1964_p3), %s1711_s12, 4294967008  ;;  %p19_p6 = scmp.ge.s32.totalorder %s2210_s24, 4   ;;  %s3780_s18 = smov %s2136_s19 }
 0x355   : > { %s3781_s19 = smov %s2140_s20  ;;  %s3782_s20 = smov %s2222_s27 }
 0x356   : > { %s3783_s21 = smov %s2210_s24  ;;  %21 = sbr.rel (!%p19_p6) target bundleno = 5 (0x5), region = 127 }
 0x35d   :  { %1725 = vsyncpa [#allocation4], 1 }
 0x35e   :  { %1727 = vsyncpa [#allocation4 + $0x1], 1 }
 0x35f   :  { %1728 = vsyncpa [#allocation6], 1 }
 0x360   :  { %1730 = vsyncpa [#allocation6 + $0x1], 1 }

</bundles_post_ra>
